<compile_context>
chip_gen: v7x
topology: tpu7x:2x2x1
jax: 0.10.0
libtpu: 0.0.40
codegen_flags: <defaults>
</compile_context>

<pallas_src>
import functools

import jax
import jax.numpy as jnp
from jax import lax
from jax.experimental import pallas as pl
from jax.experimental.pallas import tpu as pltpu

# Scoped VMEM budget for the matmul kernels: above the 32 MiB default (so the
# bigger tiles fit) but well below v7x's 64 MiB physical VMEM.
_MATMUL_VMEM_LIMIT = 40 * 1024 * 1024


# ------------------------------ tiling helper ------------------------------ #

def _pick_tile(dim, preferred, align, prefer=None):
    """Full dim if small; otherwise the largest divisor of `dim` <= `preferred`
    that is a multiple of `prefer` (e.g. 256 for the v6e/v7x MXU), falling back
    to multiples of `align` (e.g. 128 for v5e / lane alignment)."""
    if dim <= preferred:
        return dim
    for step in [s for s in (prefer, align) if s]:
        t = (preferred // step) * step
        while t >= step:
            if dim % t == 0:
                return t
            t -= step
    return dim  # no aligned divisor -> fall back to the full dim (always legal)


# ----------------------------- LayerNorm helper ----------------------------- #

def _ln_rows(h, gamma, beta, eps):
    """One-pass LayerNorm over the last axis: var = E[h^2] - mu^2.
    Both row reductions are independent (no (h - mu)^2 temporary)."""
    mu = jnp.mean(h, axis=-1, keepdims=True)
    msq = jnp.mean(h * h, axis=-1, keepdims=True)
    var = msq - mu * mu
    return (h - mu) * lax.rsqrt(var + eps) * gamma + beta


# ------------------------------ Pallas kernels ------------------------------ #

def _matmul_kernel(x_ref, w_ref, b_ref, o_ref, acc_ref, *, relu):
    """Tiled y = x @ w + b (optional ReLU).  K-reduction on grid axis 2."""
    @pl.when(pl.program_id(2) == 0)
    def _():
        acc_ref[...] = jnp.zeros_like(acc_ref)

    acc_ref[...] += jnp.dot(x_ref[...], w_ref[...],
                            preferred_element_type=jnp.float32)

    @pl.when(pl.program_id(2) == pl.num_programs(2) - 1)
    def _():
        y = acc_ref[...] + b_ref[...]
        if relu:
            y = jnp.maximum(y, 0.0)
        o_ref[...] = y.astype(o_ref.dtype)


def _matmul_res_ln_kernel(x_ref, w_ref, b_ref, r_ref, g_ref, be_ref,
                          o_ref, acc_ref, *, eps):
    """Tiled y = LayerNorm(x @ w + b + residual).  Full N (=hidden) per tile;
    K-reduction on grid axis 1; LN fused into the last-K epilogue."""
    @pl.when(pl.program_id(1) == 0)
    def _():
        acc_ref[...] = jnp.zeros_like(acc_ref)

    acc_ref[...] += jnp.dot(x_ref[...], w_ref[...],
                            preferred_element_type=jnp.float32)

    @pl.when(pl.program_id(1) == pl.num_programs(1) - 1)
    def _():
        h = acc_ref[...] + b_ref[...] + r_ref[...].astype(jnp.float32)
        o_ref[...] = _ln_rows(h, g_ref[...], be_ref[...], eps).astype(o_ref.dtype)


def _attn_kernel(qkv_ref, bias_ref, o_ref, *, num_heads, scale):
    """All-heads attention for one batch element.
    qkv: (1, S, 3D) bf16, bias: (1, 1, S) f32 additive key-padding bias.
    Output: (1, S, D) bf16, lane-dense.

    Heads are processed in 128-lane-aligned groups; each group's context is
    stored directly into o_ref (no end-of-kernel all-heads concatenate)."""
    qkv = qkv_ref[0]                    # (S, 3D) bf16
    bias = bias_ref[0]                  # (1, S)  f32
    d = qkv.shape[-1] // 3
    dh = d // num_heads

    # heads per group: widest group whose lane width is <= 128 and divides num_heads
    hg = 1
    if dh < 128:
        hg = max(1, 128 // dh)
        while num_heads % hg:
            hg -= 1
    gw = hg * dh                        # group lane width (128 when dh | 128)

    for g in range(num_heads // hg):
        lo = g * gw
        # softmax scale folded into q: S*Dh multiplies instead of S*S per head
        q_g = qkv[:, lo:lo + gw] * scale
        k_g = qkv[:, d + lo:d + lo + gw]
        v_g = qkv[:, 2 * d + lo:2 * d + lo + gw]

        parts = []
        for h in range(hg):
            sl = slice(h * dh, (h + 1) * dh)
            # scores = (q*scale) @ k^T + bias   (f32 accumulation, no k transpose)
            s = lax.dot_general(q_g[:, sl], k_g[:, sl],
                                (((1,), (1,)), ((), ())),
                                preferred_element_type=jnp.float32)
            s = s + bias
            m = jnp.max(s, axis=-1, keepdims=True)
            p = jnp.exp(s - m)
            denom = jnp.sum(p, axis=-1, keepdims=True)
            ctx = lax.dot_general(p.astype(v_g.dtype), v_g[:, sl],
                                  (((1,), (0,)), ((), ())),
                                  preferred_element_type=jnp.float32)
            parts.append(ctx / denom)   # exact normalization (matches PyTorch)

        grp = parts[0] if hg == 1 else jnp.concatenate(parts, axis=-1)
        # direct lane-aligned store; live ranges bounded to one head group
        o_ref[0, :, lo:lo + gw] = grp.astype(o_ref.dtype)


def _ln_kernel(x_ref, g_ref, b_ref, o_ref, *, eps):
    """LayerNorm only (no residual, no zeros tensor)."""
    h = x_ref[...].astype(jnp.float32)
    o_ref[...] = _ln_rows(h, g_ref[...], b_ref[...], eps).astype(o_ref.dtype)


# ------------------------------ kernel wrappers ----------------------------- #

def linear(x, w, b, *, relu=False, tm=1536, tn=1024, tk=512):
    M, K = x.shape
    N = w.shape[1]
    tm = _pick_tile(M, tm, 8, prefer=16)       # bf16 rows pack 16 per vreg
    tn = _pick_tile(N, tn, 128, prefer=256)    # v6e/v7x MXU is 2x256^2
    tk = _pick_tile(K, tk, 128, prefer=256)
    return pl.pallas_call(
        functools.partial(_matmul_kernel, relu=relu),
        out_shape=jax.ShapeDtypeStruct((M, N), jnp.bfloat16),
        grid=(M // tm, N // tn, K // tk),
        in_specs=[
            pl.BlockSpec((tm, tk), lambda i, j, k: (i, k)),
            pl.BlockSpec((tk, tn), lambda i, j, k: (k, j)),
            pl.BlockSpec((1, tn), lambda i, j, k: (0, j)),
        ],
        out_specs=pl.BlockSpec((tm, tn), lambda i, j, k: (i, j)),
        scratch_shapes=[pltpu.VMEM((tm, tn), jnp.float32)],
        compiler_params=pltpu.CompilerParams(
            dimension_semantics=("parallel", "parallel", "arbitrary"),
            vmem_limit_bytes=_MATMUL_VMEM_LIMIT),
    )(x, w, b.reshape(1, N).astype(jnp.float32))


def linear_residual_layernorm(x, w, b, residual, gamma, beta, *,
                              eps=1e-5, tm=1536, tk=512):
    """LayerNorm(x @ w + b + residual), LN fused into the matmul epilogue.
    N (= hidden size) is kept whole per tile so LN sees the full row."""
    M, K = x.shape
    N = w.shape[1]
    tm = _pick_tile(M, tm, 8, prefer=16)
    tk = _pick_tile(K, tk, 128, prefer=256)
    return pl.pallas_call(
        functools.partial(_matmul_res_ln_kernel, eps=eps),
        out_shape=jax.ShapeDtypeStruct((M, N), jnp.bfloat16),
        grid=(M // tm, K // tk),
        in_specs=[
            pl.BlockSpec((tm, tk), lambda i, k: (i, k)),
            pl.BlockSpec((tk, N), lambda i, k: (k, 0)),
            pl.BlockSpec((1, N), lambda i, k: (0, 0)),
            pl.BlockSpec((tm, N), lambda i, k: (i, 0)),
            pl.BlockSpec((1, N), lambda i, k: (0, 0)),
            pl.BlockSpec((1, N), lambda i, k: (0, 0)),
        ],
        out_specs=pl.BlockSpec((tm, N), lambda i, k: (i, 0)),
        scratch_shapes=[pltpu.VMEM((tm, N), jnp.float32)],
        compiler_params=pltpu.CompilerParams(
            dimension_semantics=("parallel", "arbitrary"),
            vmem_limit_bytes=_MATMUL_VMEM_LIMIT),
    )(x, w, b.reshape(1, N).astype(jnp.float32), residual,
      gamma.reshape(1, N).astype(jnp.float32),
      beta.reshape(1, N).astype(jnp.float32))


def attention(qkv, bias, *, num_heads, scale):
    # qkv: (B, S, 3D) bf16, bias: (B, 1, S) f32 -> (B, S, D) bf16
    B, S, D3 = qkv.shape
    D = D3 // 3
    # TODO(synk): for very long sequences (S >= ~1024), tile over query blocks
    # with an online-softmax accumulator so the (S,3D)+scores working set fits
    # v7x's 64 MiB VMEM and the qkv DMA pipelines against compute.
    return pl.pallas_call(
        functools.partial(_attn_kernel, num_heads=num_heads, scale=scale),
        out_shape=jax.ShapeDtypeStruct((B, S, D), jnp.bfloat16),
        grid=(B,),
        in_specs=[
            pl.BlockSpec((1, S, D3), lambda b: (b, 0, 0)),
            pl.BlockSpec((1, 1, S), lambda b: (b, 0, 0)),
        ],
        out_specs=pl.BlockSpec((1, S, D), lambda b: (b, 0, 0)),
        compiler_params=pltpu.CompilerParams(
            dimension_semantics=("parallel",)),
    )(qkv, bias)


def layernorm(x, gamma, beta, *, eps=1e-5, out_dtype=jnp.float32, tm=1024):
    M, D = x.shape
    tm = _pick_tile(M, tm, 8, prefer=16)
    return pl.pallas_call(
        functools.partial(_ln_kernel, eps=eps),
        out_shape=jax.ShapeDtypeStruct((M, D), out_dtype),
        grid=(M // tm,),
        in_specs=[
            pl.BlockSpec((tm, D), lambda i: (i, 0)),
            pl.BlockSpec((1, D), lambda i: (0, 0)),
            pl.BlockSpec((1, D), lambda i: (0, 0)),
        ],
        out_specs=pl.BlockSpec((tm, D), lambda i: (i, 0)),
        compiler_params=pltpu.CompilerParams(
            dimension_semantics=("parallel",)),
    )(x, gamma.reshape(1, D).astype(jnp.float32),
      beta.reshape(1, D).astype(jnp.float32))


# ------------------------------ parameter init ------------------------------ #

def init_params(key, vocab_size, hidden_size, num_heads, num_layers,
                intermediate_size, max_len):
    def nrm(k, shape, scale=0.02, dtype=jnp.float32):
        return (scale * jax.random.normal(k, shape)).astype(dtype)

    keys = jax.random.split(key, 3 + num_layers)
    params = {
        "token_emb": nrm(keys[0], (vocab_size, hidden_size)),
        "pos_emb": nrm(keys[1], (max_len, hidden_size)),
        "type_emb": nrm(keys[2], (2, hidden_size)),
        "norm_g": jnp.ones((hidden_size,), jnp.float32),
        "norm_b": jnp.zeros((hidden_size,), jnp.float32),
        "layers": [],
    }
    bf16 = jnp.bfloat16
    for li in range(num_layers):
        lk = jax.random.split(keys[3 + li], 4)
        params["layers"].append({
            "qkv_w": nrm(lk[0], (hidden_size, 3 * hidden_size), dtype=bf16),
            "qkv_b": jnp.zeros((3 * hidden_size,), jnp.float32),
            "out_w": nrm(lk[1], (hidden_size, hidden_size), dtype=bf16),
            "out_b": jnp.zeros((hidden_size,), jnp.float32),
            "ln1_g": jnp.ones((hidden_size,), jnp.float32),
            "ln1_b": jnp.zeros((hidden_size,), jnp.float32),
            "fc1_w": nrm(lk[2], (hidden_size, intermediate_size), dtype=bf16),
            "fc1_b": jnp.zeros((intermediate_size,), jnp.float32),
            "fc2_w": nrm(lk[3], (intermediate_size, hidden_size), dtype=bf16),
            "fc2_b": jnp.zeros((hidden_size,), jnp.float32),
            "ln2_g": jnp.ones((hidden_size,), jnp.float32),
            "ln2_b": jnp.zeros((hidden_size,), jnp.float32),
        })
    return params


# ------------------------------- forward pass ------------------------------- #

def encoder_forward(params, input_ids, token_type_ids, attention_mask,
                    num_heads):
    B, S = input_ids.shape
    D = params["token_emb"].shape[1]
    H = num_heads
    Dh = D // H
    scale = float(1.0 / (Dh ** 0.5))

    # --- embeddings (gather = plain-JAX glue, not the hot path) ---
    positions = jnp.arange(S, dtype=jnp.int32)
    x = (params["token_emb"][input_ids]
         + params["pos_emb"][positions][None, :, :]
         + params["type_emb"][token_type_ids])                 # (B, S, D) f32
    x = x.reshape(B * S, D).astype(jnp.bfloat16)               # lane-dense bf16

    # key_padding_mask semantics: attention_mask == 0 -> masked key
    bias = jnp.where(attention_mask.astype(bool), 0.0, -1e30)
    bias = bias.astype(jnp.float32).reshape(B, 1, S)           # additive over keys

    for lp in params["layers"]:
        # --- multi-head self-attention (QKV stays lane-dense; no head transposes) ---
        qkv = linear(x, lp["qkv_w"], lp["qkv_b"])              # (B*S, 3D) bf16
        ctx = attention(qkv.reshape(B, S, 3 * D), bias,
                        num_heads=H, scale=scale)              # (B, S, D) bf16
        ctx = ctx.reshape(B * S, D)

        # --- out-projection with fused residual-add + LayerNorm 1 ---
        x = linear_residual_layernorm(ctx, lp["out_w"], lp["out_b"],
                                      x, lp["ln1_g"], lp["ln1_b"])

        # --- feed-forward: fc1+ReLU, then fc2 with fused residual + LayerNorm 2 ---
        ff = linear(x, lp["fc1_w"], lp["fc1_b"], relu=True)    # (B*S, I) bf16
        x = linear_residual_layernorm(ff, lp["fc2_w"], lp["fc2_b"],
                                      x, lp["ln2_g"], lp["ln2_b"])

    # final LayerNorm (no residual), output f32 to match the PyTorch module
    x = layernorm(x, params["norm_g"], params["norm_b"], out_dtype=jnp.float32)
    return x.reshape(B, S, D)


# ----------------------------------- main ----------------------------------- #

if __name__ == "__main__":
    VOCAB, HIDDEN, HEADS, LAYERS, INTER, MAX_LEN = 100, 32, 4, 2, 64, 64
    B, S = 2, 8

    root = jax.random.PRNGKey(0)
    k_par, k_ids, k_types = jax.random.split(root, 3)

    params = init_params(k_par, VOCAB, HIDDEN, HEADS, LAYERS, INTER, MAX_LEN)

    input_ids = jax.random.randint(k_ids, (B, S), 0, VOCAB, dtype=jnp.int32)
    token_type_ids = jax.random.randint(k_types, (B, S), 0, 2, dtype=jnp.int32)
    attention_mask = jnp.ones((B, S), jnp.int32).at[1, S - 2:].set(0)  # pad tail of batch 1

    fwd = jax.jit(functools.partial(encoder_forward, num_heads=HEADS))
    out = fwd(params, input_ids, token_type_ids, attention_mask)
    out = jax.block_until_ready(out)

    assert out.shape == (B, S, HIDDEN)
    assert jnp.all(jnp.isfinite(out))
    print("KERNEL_OK")
</pallas_src>

<mosaic_0001>
module attributes {stable_mosaic.version = 11 : i64} {
  func.func @_matmul_kernel(%arg0: i32, %arg1: i32, %arg2: i32, %arg3: memref<16x32xbf16, #tpu.memory_space<vmem>>, %arg4: memref<32x96xbf16, #tpu.memory_space<vmem>>, %arg5: memref<1x96xf32, #tpu.memory_space<vmem>>, %arg6: memref<16x96xbf16, #tpu.memory_space<vmem>>, %arg7: memref<16x96xf32, #tpu.memory_space<vmem>>) attributes {dimension_semantics = [#tpu.dimension_semantics<parallel>, #tpu.dimension_semantics<parallel>, #tpu.dimension_semantics<arbitrary>], iteration_bounds = array<i64: 1, 1, 1>, scalar_prefetch = 0 : i64, scratch_operands = 1 : i64, tpu.core_type = #tpu.core_type<tc>, window_params = [{transform_indices = @transform_0, window_bounds = array<i64: 16, 32>}, {transform_indices = @transform_1, window_bounds = array<i64: 32, 96>}, {transform_indices = @transform_2, window_bounds = array<i64: 1, 96>}, {transform_indices = @transform_3, window_bounds = array<i64: 16, 96>}]} {
    %c0_i32 = arith.constant 0 : i32
    %0 = arith.cmpi eq, %arg2, %c0_i32 : i32
    %1 = arith.extui %0 : i1 to i32
    %c0_i32_0 = arith.constant 0 : i32
    %2 = arith.cmpi ne, %1, %c0_i32_0 : i32
    scf.if %2 {
      %cst_10 = arith.constant 0.000000e+00 : f32
      %12 = vector.broadcast %cst_10 : f32 to vector<16x96xf32>
      %c0_11 = arith.constant 0 : index
      %c0_12 = arith.constant 0 : index
      %13 = vector.load %arg7[%c0_11, %c0_12] : memref<16x96xf32, #tpu.memory_space<vmem>>, vector<16x96xf32>
      tpu.vector_store %arg7[%c0_11, %c0_12], %12 {strides = array<i32>} : memref<16x96xf32, #tpu.memory_space<vmem>>, vector<16x96xf32>,
    } else {
    }
    %c0 = arith.constant 0 : index
    %c0_1 = arith.constant 0 : index
    %3 = vector.load %arg7[%c0, %c0_1] : memref<16x96xf32, #tpu.memory_space<vmem>>, vector<16x96xf32>
    %c0_2 = arith.constant 0 : index
    %c0_3 = arith.constant 0 : index
    %4 = vector.load %arg3[%c0_2, %c0_3] : memref<16x32xbf16, #tpu.memory_space<vmem>>, vector<16x32xbf16>
    %c0_4 = arith.constant 0 : index
    %c0_5 = arith.constant 0 : index
    %5 = vector.load %arg4[%c0_4, %c0_5] : memref<32x96xbf16, #tpu.memory_space<vmem>>, vector<32x96xbf16>
    %cst = arith.constant dense<0.000000e+00> : vector<16x96xf32>
    %6 = tpu.matmul %4, %5, %cst {dimension_numbers = #tpu.dot_dimension_numbers<[1], [0], [0], [1], [0, 0, 1, 1], [], []>} : vector<16x32xbf16>, vector<32x96xbf16>, vector<16x96xf32> -> vector<16x96xf32>
    %7 = arith.addf %3, %6 : vector<16x96xf32>
    %c0_6 = arith.constant 0 : index
    %c0_7 = arith.constant 0 : index
    %8 = vector.load %arg7[%c0_6, %c0_7] : memref<16x96xf32, #tpu.memory_space<vmem>>, vector<16x96xf32>
    tpu.vector_store %arg7[%c0_6, %c0_7], %7 {strides = array<i32>} : memref<16x96xf32, #tpu.memory_space<vmem>>, vector<16x96xf32>,
    %c0_i32_8 = arith.constant 0 : i32
    %9 = arith.cmpi eq, %arg2, %c0_i32_8 : i32
    %10 = arith.extui %9 : i1 to i32
    %c0_i32_9 = arith.constant 0 : i32
    %11 = arith.cmpi ne, %10, %c0_i32_9 : i32
    scf.if %11 {
      %c0_10 = arith.constant 0 : index
      %c0_11 = arith.constant 0 : index
      %12 = vector.load %arg7[%c0_10, %c0_11] : memref<16x96xf32, #tpu.memory_space<vmem>>, vector<16x96xf32>
      %c0_12 = arith.constant 0 : index
      %c0_13 = arith.constant 0 : index
      %13 = vector.load %arg5[%c0_12, %c0_13] : memref<1x96xf32, #tpu.memory_space<vmem>>, vector<1x96xf32>
      %14 = vector.broadcast %13 : vector<1x96xf32> to vector<16x96xf32>
      %15 = arith.addf %12, %14 : vector<16x96xf32>
      %16 = arith.truncf %15 : vector<16x96xf32> to vector<16x96xbf16>
      %c0_14 = arith.constant 0 : index
      %c0_15 = arith.constant 0 : index
      %17 = vector.load %arg6[%c0_14, %c0_15] : memref<16x96xbf16, #tpu.memory_space<vmem>>, vector<16x96xbf16>
      tpu.vector_store %arg6[%c0_14, %c0_15], %16 {strides = array<i32>} : memref<16x96xbf16, #tpu.memory_space<vmem>>, vector<16x96xbf16>,
    } else {
    }
    return
  }
  func.func @transform_0(%arg0: i32, %arg1: i32, %arg2: i32) -> (i32, i32) {
    %c0_i32 = arith.constant 0 : i32
    return %arg0, %arg2 : i32, i32
  }
  func.func @transform_1(%arg0: i32, %arg1: i32, %arg2: i32) -> (i32, i32) {
    %c0_i32 = arith.constant 0 : i32
    return %arg2, %arg1 : i32, i32
  }
  func.func @transform_2(%arg0: i32, %arg1: i32, %arg2: i32) -> (i32, i32) {
    %c0_i32 = arith.constant 0 : i32
    %c0_i32_0 = arith.constant 0 : i32
    return %c0_i32, %arg1 : i32, i32
  }
  func.func @transform_3(%arg0: i32, %arg1: i32, %arg2: i32) -> (i32, i32) {
    %c0_i32 = arith.constant 0 : i32
    return %arg0, %arg1 : i32, i32
  }
}

module attributes {stable_mosaic.version = 11 : i64} {
  func.func @_attn_kernel(%arg0: i32, %arg1: memref<1x8x96xbf16, #tpu.memory_space<vmem>>, %arg2: memref<1x1x8xf32, #tpu.memory_space<vmem>>, %arg3: memref<1x8x32xbf16, #tpu.memory_space<vmem>>) attributes {dimension_semantics = [#tpu.dimension_semantics<parallel>], iteration_bounds = array<i64: 2>, scalar_prefetch = 0 : i64, scratch_operands = 0 : i64, tpu.core_type = #tpu.core_type<tc>, window_params = [{transform_indices = @transform_0, window_bounds = array<i64: 1, 8, 96>}, {transform_indices = @transform_1, window_bounds = array<i64: 1, 1, 8>}, {transform_indices = @transform_2, window_bounds = array<i64: 1, 8, 32>}]} {
    %c0 = arith.constant 0 : index
    %c0_0 = arith.constant 0 : index
    %c0_1 = arith.constant 0 : index
    %0 = vector.load %arg1[%c0, %c0_0, %c0_1] : memref<1x8x96xbf16, #tpu.memory_space<vmem>>, vector<1x8x96xbf16>
    %1 = vector.shape_cast %0 : vector<1x8x96xbf16> to vector<8x96xbf16>
    %c0_2 = arith.constant 0 : index
    %c0_3 = arith.constant 0 : index
    %c0_4 = arith.constant 0 : index
    %2 = vector.load %arg2[%c0_2, %c0_3, %c0_4] : memref<1x1x8xf32, #tpu.memory_space<vmem>>, vector<1x1x8xf32>
    %3 = vector.shape_cast %2 : vector<1x1x8xf32> to vector<1x8xf32>
    %4 = vector.extract_strided_slice %1 {offsets = [0, 0], sizes = [8, 32], strides = [1, 1]} : vector<8x96xbf16> to vector<8x32xbf16>
    %cst = arith.constant 3.535160e-01 : bf16
    %5 = vector.broadcast %cst : bf16 to vector<8x32xbf16>
    %6 = arith.mulf %4, %5 : vector<8x32xbf16>
    %7 = vector.extract_strided_slice %1 {offsets = [0, 32], sizes = [8, 32], strides = [1, 1]} : vector<8x96xbf16> to vector<8x32xbf16>
    %8 = vector.extract_strided_slice %1 {offsets = [0, 64], sizes = [8, 32], strides = [1, 1]} : vector<8x96xbf16> to vector<8x32xbf16>
    %9 = vector.extract_strided_slice %6 {offsets = [0, 0], sizes = [8, 8], strides = [1, 1]} : vector<8x32xbf16> to vector<8x8xbf16>
    %10 = vector.extract_strided_slice %7 {offsets = [0, 0], sizes = [8, 8], strides = [1, 1]} : vector<8x32xbf16> to vector<8x8xbf16>
    %cst_5 = arith.constant dense<0.000000e+00> : vector<8x8xf32>
    %11 = tpu.matmul %9, %10, %cst_5 {dimension_numbers = #tpu.dot_dimension_numbers<[1], [1], [0], [0], [0, 0, 1, 0], [], []>} : vector<8x8xbf16>, vector<8x8xbf16>, vector<8x8xf32> -> vector<8x8xf32>
    %12 = vector.broadcast %3 : vector<1x8xf32> to vector<8x8xf32>
    %13 = arith.addf %11, %12 : vector<8x8xf32>
    %cst_6 = arith.constant dense<0xFF800000> : vector<8xf32>
    %14 = vector.multi_reduction <maximumf>, %13, %cst_6 [1] : vector<8x8xf32> to vector<8xf32>
    %15 = vector.shape_cast %14 : vector<8xf32> to vector<8x1xf32>
    %16 = vector.broadcast %15 : vector<8x1xf32> to vector<8x8xf32>
    %17 = arith.subf %13, %16 : vector<8x8xf32>
    %18 = math.exp %17 : vector<8x8xf32>
    %cst_7 = arith.constant dense<0.000000e+00> : vector<8xf32>
    %19 = vector.multi_reduction <add>, %18, %cst_7 [1] : vector<8x8xf32> to vector<8xf32>
    %20 = vector.shape_cast %19 : vector<8xf32> to vector<8x1xf32>
    %21 = arith.truncf %18 : vector<8x8xf32> to vector<8x8xbf16>
    %22 = vector.extract_strided_slice %8 {offsets = [0, 0], sizes = [8, 8], strides = [1, 1]} : vector<8x32xbf16> to vector<8x8xbf16>
    %cst_8 = arith.constant dense<0.000000e+00> : vector<8x8xf32>
    %23 = tpu.matmul %21, %22, %cst_8 {dimension_numbers = #tpu.dot_dimension_numbers<[1], [0], [0], [1], [0, 0, 1, 1], [], []>} : vector<8x8xbf16>, vector<8x8xbf16>, vector<8x8xf32> -> vector<8x8xf32>
    %24 = vector.broadcast %20 : vector<8x1xf32> to vector<8x8xf32>
    %25 = arith.divf %23, %24 : vector<8x8xf32>
    %26 = vector.extract_strided_slice %6 {offsets = [0, 8], sizes = [8, 8], strides = [1, 1]} : vector<8x32xbf16> to vector<8x8xbf16>
    %27 = vector.extract_strided_slice %7 {offsets = [0, 8], sizes = [8, 8], strides = [1, 1]} : vector<8x32xbf16> to vector<8x8xbf16>
    %cst_9 = arith.constant dense<0.000000e+00> : vector<8x8xf32>
    %28 = tpu.matmul %26, %27, %cst_9 {dimension_numbers = #tpu.dot_dimension_numbers<[1], [1], [0], [0], [0, 0, 1, 0], [], []>} : vector<8x8xbf16>, vector<8x8xbf16>, vector<8x8xf32> -> vector<8x8xf32>
    %29 = vector.broadcast %3 : vector<1x8xf32> to vector<8x8xf32>
    %30 = arith.addf %28, %29 : vector<8x8xf32>
    %cst_10 = arith.constant dense<0xFF800000> : vector<8xf32>
    %31 = vector.multi_reduction <maximumf>, %30, %cst_10 [1] : vector<8x8xf32> to vector<8xf32>
    %32 = vector.shape_cast %31 : vector<8xf32> to vector<8x1xf32>
    %33 = vector.broadcast %32 : vector<8x1xf32> to vector<8x8xf32>
    %34 = arith.subf %30, %33 : vector<8x8xf32>
    %35 = math.exp %34 : vector<8x8xf32>
    %cst_11 = arith.constant dense<0.000000e+00> : vector<8xf32>
    %36 = vector.multi_reduction <add>, %35, %cst_11 [1] : vector<8x8xf32> to vector<8xf32>
    %37 = vector.shape_cast %36 : vector<8xf32> to vector<8x1xf32>
    %38 = arith.truncf %35 : vector<8x8xf32> to vector<8x8xbf16>
    %39 = vector.extract_strided_slice %8 {offsets = [0, 8], sizes = [8, 8], strides = [1, 1]} : vector<8x32xbf16> to vector<8x8xbf16>
    %cst_12 = arith.constant dense<0.000000e+00> : vector<8x8xf32>
    %40 = tpu.matmul %38, %39, %cst_12 {dimension_numbers = #tpu.dot_dimension_numbers<[1], [0], [0], [1], [0, 0, 1, 1], [], []>} : vector<8x8xbf16>, vector<8x8xbf16>, vector<8x8xf32> -> vector<8x8xf32>
    %41 = vector.broadcast %37 : vector<8x1xf32> to vector<8x8xf32>
    %42 = arith.divf %40, %41 : vector<8x8xf32>
    %43 = vector.extract_strided_slice %6 {offsets = [0, 16], sizes = [8, 8], strides = [1, 1]} : vector<8x32xbf16> to vector<8x8xbf16>
    %44 = vector.extract_strided_slice %7 {offsets = [0, 16], sizes = [8, 8], strides = [1, 1]} : vector<8x32xbf16> to vector<8x8xbf16>
    %cst_13 = arith.constant dense<0.000000e+00> : vector<8x8xf32>
    %45 = tpu.matmul %43, %44, %cst_13 {dimension_numbers = #tpu.dot_dimension_numbers<[1], [1], [0], [0], [0, 0, 1, 0], [], []>} : vector<8x8xbf16>, vector<8x8xbf16>, vector<8x8xf32> -> vector<8x8xf32>
    %46 = vector.broadcast %3 : vector<1x8xf32> to vector<8x8xf32>
    %47 = arith.addf %45, %46 : vector<8x8xf32>
    %cst_14 = arith.constant dense<0xFF800000> : vector<8xf32>
    %48 = vector.multi_reduction <maximumf>, %47, %cst_14 [1] : vector<8x8xf32> to vector<8xf32>
    %49 = vector.shape_cast %48 : vector<8xf32> to vector<8x1xf32>
    %50 = vector.broadcast %49 : vector<8x1xf32> to vector<8x8xf32>
    %51 = arith.subf %47, %50 : vector<8x8xf32>
    %52 = math.exp %51 : vector<8x8xf32>
    %cst_15 = arith.constant dense<0.000000e+00> : vector<8xf32>
    %53 = vector.multi_reduction <add>, %52, %cst_15 [1] : vector<8x8xf32> to vector<8xf32>
    %54 = vector.shape_cast %53 : vector<8xf32> to vector<8x1xf32>
    %55 = arith.truncf %52 : vector<8x8xf32> to vector<8x8xbf16>
    %56 = vector.extract_strided_slice %8 {offsets = [0, 16], sizes = [8, 8], strides = [1, 1]} : vector<8x32xbf16> to vector<8x8xbf16>
    %cst_16 = arith.constant dense<0.000000e+00> : vector<8x8xf32>
    %57 = tpu.matmul %55, %56, %cst_16 {dimension_numbers = #tpu.dot_dimension_numbers<[1], [0], [0], [1], [0, 0, 1, 1], [], []>} : vector<8x8xbf16>, vector<8x8xbf16>, vector<8x8xf32> -> vector<8x8xf32>
    %58 = vector.broadcast %54 : vector<8x1xf32> to vector<8x8xf32>
    %59 = arith.divf %57, %58 : vector<8x8xf32>
    %60 = vector.extract_strided_slice %6 {offsets = [0, 24], sizes = [8, 8], strides = [1, 1]} : vector<8x32xbf16> to vector<8x8xbf16>
    %61 = vector.extract_strided_slice %7 {offsets = [0, 24], sizes = [8, 8], strides = [1, 1]} : vector<8x32xbf16> to vector<8x8xbf16>
    %cst_17 = arith.constant dense<0.000000e+00> : vector<8x8xf32>
    %62 = tpu.matmul %60, %61, %cst_17 {dimension_numbers = #tpu.dot_dimension_numbers<[1], [1], [0], [0], [0, 0, 1, 0], [], []>} : vector<8x8xbf16>, vector<8x8xbf16>, vector<8x8xf32> -> vector<8x8xf32>
    %63 = vector.broadcast %3 : vector<1x8xf32> to vector<8x8xf32>
    %64 = arith.addf %62, %63 : vector<8x8xf32>
    %cst_18 = arith.constant dense<0xFF800000> : vector<8xf32>
    %65 = vector.multi_reduction <maximumf>, %64, %cst_18 [1] : vector<8x8xf32> to vector<8xf32>
    %66 = vector.shape_cast %65 : vector<8xf32> to vector<8x1xf32>
    %67 = vector.broadcast %66 : vector<8x1xf32> to vector<8x8xf32>
    %68 = arith.subf %64, %67 : vector<8x8xf32>
    %69 = math.exp %68 : vector<8x8xf32>
    %cst_19 = arith.constant dense<0.000000e+00> : vector<8xf32>
    %70 = vector.multi_reduction <add>, %69, %cst_19 [1] : vector<8x8xf32> to vector<8xf32>
    %71 = vector.shape_cast %70 : vector<8xf32> to vector<8x1xf32>
    %72 = arith.truncf %69 : vector<8x8xf32> to vector<8x8xbf16>
    %73 = vector.extract_strided_slice %8 {offsets = [0, 24], sizes = [8, 8], strides = [1, 1]} : vector<8x32xbf16> to vector<8x8xbf16>
    %cst_20 = arith.constant dense<0.000000e+00> : vector<8x8xf32>
    %74 = tpu.matmul %72, %73, %cst_20 {dimension_numbers = #tpu.dot_dimension_numbers<[1], [0], [0], [1], [0, 0, 1, 1], [], []>} : vector<8x8xbf16>, vector<8x8xbf16>, vector<8x8xf32> -> vector<8x8xf32>
    %75 = vector.broadcast %71 : vector<8x1xf32> to vector<8x8xf32>
    %76 = arith.divf %74, %75 : vector<8x8xf32>
    %77 = tpu.concatenate %25, %42, %59, %76 in 1 : vector<8x8xf32>, vector<8x8xf32>, vector<8x8xf32>, vector<8x8xf32> -> vector<8x32xf32>
    %78 = arith.truncf %77 : vector<8x32xf32> to vector<8x32xbf16>
    %c0_21 = arith.constant 0 : index
    %c0_22 = arith.constant 0 : index
    %c0_23 = arith.constant 0 : index
    %79 = vector.load %arg3[%c0_21, %c0_22, %c0_23] : memref<1x8x32xbf16, #tpu.memory_space<vmem>>, vector<1x8x32xbf16>
    %80 = vector.shape_cast %79 : vector<1x8x32xbf16> to vector<8x32xbf16>
    %81 = vector.shape_cast %78 : vector<8x32xbf16> to vector<1x8x32xbf16>
    tpu.vector_store %arg3[%c0_21, %c0_22, %c0_23], %81 {strides = array<i32>} : memref<1x8x32xbf16, #tpu.memory_space<vmem>>, vector<1x8x32xbf16>,
    return
  }
  func.func @transform_0(%arg0: i32) -> (i32, i32, i32) {
    %c0_i32 = arith.constant 0 : i32
    %c0_i32_0 = arith.constant 0 : i32
    %c0_i32_1 = arith.constant 0 : i32
    return %arg0, %c0_i32, %c0_i32_0 : i32, i32, i32
  }
  func.func @transform_1(%arg0: i32) -> (i32, i32, i32) {
    %c0_i32 = arith.constant 0 : i32
    %c0_i32_0 = arith.constant 0 : i32
    %c0_i32_1 = arith.constant 0 : i32
    return %arg0, %c0_i32, %c0_i32_0 : i32, i32, i32
  }
  func.func @transform_2(%arg0: i32) -> (i32, i32, i32) {
    %c0_i32 = arith.constant 0 : i32
    %c0_i32_0 = arith.constant 0 : i32
    %c0_i32_1 = arith.constant 0 : i32
    return %arg0, %c0_i32, %c0_i32_0 : i32, i32, i32
  }
}

module attributes {stable_mosaic.version = 11 : i64} {
  func.func @_matmul_kernel(%arg0: i32, %arg1: i32, %arg2: i32, %arg3: memref<16x32xbf16, #tpu.memory_space<vmem>>, %arg4: memref<32x64xbf16, #tpu.memory_space<vmem>>, %arg5: memref<1x64xf32, #tpu.memory_space<vmem>>, %arg6: memref<16x64xbf16, #tpu.memory_space<vmem>>, %arg7: memref<16x64xf32, #tpu.memory_space<vmem>>) attributes {dimension_semantics = [#tpu.dimension_semantics<parallel>, #tpu.dimension_semantics<parallel>, #tpu.dimension_semantics<arbitrary>], iteration_bounds = array<i64: 1, 1, 1>, scalar_prefetch = 0 : i64, scratch_operands = 1 : i64, tpu.core_type = #tpu.core_type<tc>, window_params = [{transform_indices = @transform_0, window_bounds = array<i64: 16, 32>}, {transform_indices = @transform_1, window_bounds = array<i64: 32, 64>}, {transform_indices = @transform_2, window_bounds = array<i64: 1, 64>}, {transform_indices = @transform_3, window_bounds = array<i64: 16, 64>}]} {
    %c0_i32 = arith.constant 0 : i32
    %0 = arith.cmpi eq, %arg2, %c0_i32 : i32
    %1 = arith.extui %0 : i1 to i32
    %c0_i32_0 = arith.constant 0 : i32
    %2 = arith.cmpi ne, %1, %c0_i32_0 : i32
    scf.if %2 {
      %cst_10 = arith.constant 0.000000e+00 : f32
      %12 = vector.broadcast %cst_10 : f32 to vector<16x64xf32>
      %c0_11 = arith.constant 0 : index
      %c0_12 = arith.constant 0 : index
      %13 = vector.load %arg7[%c0_11, %c0_12] : memref<16x64xf32, #tpu.memory_space<vmem>>, vector<16x64xf32>
      tpu.vector_store %arg7[%c0_11, %c0_12], %12 {strides = array<i32>} : memref<16x64xf32, #tpu.memory_space<vmem>>, vector<16x64xf32>,
    } else {
    }
    %c0 = arith.constant 0 : index
    %c0_1 = arith.constant 0 : index
    %3 = vector.load %arg7[%c0, %c0_1] : memref<16x64xf32, #tpu.memory_space<vmem>>, vector<16x64xf32>
    %c0_2 = arith.constant 0 : index
    %c0_3 = arith.constant 0 : index
    %4 = vector.load %arg3[%c0_2, %c0_3] : memref<16x32xbf16, #tpu.memory_space<vmem>>, vector<16x32xbf16>
    %c0_4 = arith.constant 0 : index
    %c0_5 = arith.constant 0 : index
    %5 = vector.load %arg4[%c0_4, %c0_5] : memref<32x64xbf16, #tpu.memory_space<vmem>>, vector<32x64xbf16>
    %cst = arith.constant dense<0.000000e+00> : vector<16x64xf32>
    %6 = tpu.matmul %4, %5, %cst {dimension_numbers = #tpu.dot_dimension_numbers<[1], [0], [0], [1], [0, 0, 1, 1], [], []>} : vector<16x32xbf16>, vector<32x64xbf16>, vector<16x64xf32> -> vector<16x64xf32>
    %7 = arith.addf %3, %6 : vector<16x64xf32>
    %c0_6 = arith.constant 0 : index
    %c0_7 = arith.constant 0 : index
    %8 = vector.load %arg7[%c0_6, %c0_7] : memref<16x64xf32, #tpu.memory_space<vmem>>, vector<16x64xf32>
    tpu.vector_store %arg7[%c0_6, %c0_7], %7 {strides = array<i32>} : memref<16x64xf32, #tpu.memory_space<vmem>>, vector<16x64xf32>,
    %c0_i32_8 = arith.constant 0 : i32
    %9 = arith.cmpi eq, %arg2, %c0_i32_8 : i32
    %10 = arith.extui %9 : i1 to i32
    %c0_i32_9 = arith.constant 0 : i32
    %11 = arith.cmpi ne, %10, %c0_i32_9 : i32
    scf.if %11 {
      %c0_10 = arith.constant 0 : index
      %c0_11 = arith.constant 0 : index
      %12 = vector.load %arg7[%c0_10, %c0_11] : memref<16x64xf32, #tpu.memory_space<vmem>>, vector<16x64xf32>
      %c0_12 = arith.constant 0 : index
      %c0_13 = arith.constant 0 : index
      %13 = vector.load %arg5[%c0_12, %c0_13] : memref<1x64xf32, #tpu.memory_space<vmem>>, vector<1x64xf32>
      %14 = vector.broadcast %13 : vector<1x64xf32> to vector<16x64xf32>
      %15 = arith.addf %12, %14 : vector<16x64xf32>
      %cst_14 = arith.constant 0.000000e+00 : f32
      %16 = vector.broadcast %cst_14 : f32 to vector<16x64xf32>
      %17 = arith.maximumf %15, %16 : vector<16x64xf32>
      %18 = arith.truncf %17 : vector<16x64xf32> to vector<16x64xbf16>
      %c0_15 = arith.constant 0 : index
      %c0_16 = arith.constant 0 : index
      %19 = vector.load %arg6[%c0_15, %c0_16] : memref<16x64xbf16, #tpu.memory_space<vmem>>, vector<16x64xbf16>
      tpu.vector_store %arg6[%c0_15, %c0_16], %18 {strides = array<i32>} : memref<16x64xbf16, #tpu.memory_space<vmem>>, vector<16x64xbf16>,
    } else {
    }
    return
  }
  func.func @transform_0(%arg0: i32, %arg1: i32, %arg2: i32) -> (i32, i32) {
    %c0_i32 = arith.constant 0 : i32
    return %arg0, %arg2 : i32, i32
  }
  func.func @transform_1(%arg0: i32, %arg1: i32, %arg2: i32) -> (i32, i32) {
    %c0_i32 = arith.constant 0 : i32
    return %arg2, %arg1 : i32, i32
  }
  func.func @transform_2(%arg0: i32, %arg1: i32, %arg2: i32) -> (i32, i32) {
    %c0_i32 = arith.constant 0 : i32
    %c0_i32_0 = arith.constant 0 : i32
    return %c0_i32, %arg1 : i32, i32
  }
  func.func @transform_3(%arg0: i32, %arg1: i32, %arg2: i32) -> (i32, i32) {
    %c0_i32 = arith.constant 0 : i32
    return %arg0, %arg1 : i32, i32
  }
}

module attributes {stable_mosaic.version = 11 : i64} {
  func.func @_matmul_res_ln_kernel(%arg0: i32, %arg1: i32, %arg2: memref<16x32xbf16, #tpu.memory_space<vmem>>, %arg3: memref<32x32xbf16, #tpu.memory_space<vmem>>, %arg4: memref<1x32xf32, #tpu.memory_space<vmem>>, %arg5: memref<16x32xbf16, #tpu.memory_space<vmem>>, %arg6: memref<1x32xf32, #tpu.memory_space<vmem>>, %arg7: memref<1x32xf32, #tpu.memory_space<vmem>>, %arg8: memref<16x32xbf16, #tpu.memory_space<vmem>>, %arg9: memref<16x32xf32, #tpu.memory_space<vmem>>) attributes {dimension_semantics = [#tpu.dimension_semantics<parallel>, #tpu.dimension_semantics<arbitrary>], iteration_bounds = array<i64: 1, 1>, scalar_prefetch = 0 : i64, scratch_operands = 1 : i64, tpu.core_type = #tpu.core_type<tc>, window_params = [{transform_indices = @transform_0, window_bounds = array<i64: 16, 32>}, {transform_indices = @transform_1, window_bounds = array<i64: 32, 32>}, {pipeline_mode = #tpu.pipeline_mode<synchronous>, transform_indices = @transform_2, window_bounds = array<i64: 1, 32>}, {transform_indices = @transform_3, window_bounds = array<i64: 16, 32>}, {pipeline_mode = #tpu.pipeline_mode<synchronous>, transform_indices = @transform_4, window_bounds = array<i64: 1, 32>}, {pipeline_mode = #tpu.pipeline_mode<synchronous>, transform_indices = @transform_5, window_bounds = array<i64: 1, 32>}, {transform_indices = @transform_6, window_bounds = array<i64: 16, 32>}]} {
    %c0_i32 = arith.constant 0 : i32
    %0 = arith.cmpi eq, %arg1, %c0_i32 : i32
    %1 = arith.extui %0 : i1 to i32
    %c0_i32_0 = arith.constant 0 : i32
    %2 = arith.cmpi ne, %1, %c0_i32_0 : i32
    scf.if %2 {
      %cst_10 = arith.constant 0.000000e+00 : f32
      %12 = vector.broadcast %cst_10 : f32 to vector<16x32xf32>
      %c0_11 = arith.constant 0 : index
      %c0_12 = arith.constant 0 : index
      %13 = vector.load %arg9[%c0_11, %c0_12] : memref<16x32xf32, #tpu.memory_space<vmem>>, vector<16x32xf32>
      tpu.vector_store %arg9[%c0_11, %c0_12], %12 {strides = array<i32>} : memref<16x32xf32, #tpu.memory_space<vmem>>, vector<16x32xf32>,
    } else {
    }
    %c0 = arith.constant 0 : index
    %c0_1 = arith.constant 0 : index
    %3 = vector.load %arg9[%c0, %c0_1] : memref<16x32xf32, #tpu.memory_space<vmem>>, vector<16x32xf32>
    %c0_2 = arith.constant 0 : index
    %c0_3 = arith.constant 0 : index
    %4 = vector.load %arg2[%c0_2, %c0_3] : memref<16x32xbf16, #tpu.memory_space<vmem>>, vector<16x32xbf16>
    %c0_4 = arith.constant 0 : index
    %c0_5 = arith.constant 0 : index
    %5 = vector.load %arg3[%c0_4, %c0_5] : memref<32x32xbf16, #tpu.memory_space<vmem>>, vector<32x32xbf16>
    %cst = arith.constant dense<0.000000e+00> : vector<16x32xf32>
    %6 = tpu.matmul %4, %5, %cst {dimension_numbers = #tpu.dot_dimension_numbers<[1], [0], [0], [1], [0, 0, 1, 1], [], []>} : vector<16x32xbf16>, vector<32x32xbf16>, vector<16x32xf32> -> vector<16x32xf32>
    %7 = arith.addf %3, %6 : vector<16x32xf32>
    %c0_6 = arith.constant 0 : index
    %c0_7 = arith.constant 0 : index
    %8 = vector.load %arg9[%c0_6, %c0_7] : memref<16x32xf32, #tpu.memory_space<vmem>>, vector<16x32xf32>
    tpu.vector_store %arg9[%c0_6, %c0_7], %7 {strides = array<i32>} : memref<16x32xf32, #tpu.memory_space<vmem>>, vector<16x32xf32>,
    %c0_i32_8 = arith.constant 0 : i32
    %9 = arith.cmpi eq, %arg1, %c0_i32_8 : i32
    %10 = arith.extui %9 : i1 to i32
    %c0_i32_9 = arith.constant 0 : i32
    %11 = arith.cmpi ne, %10, %c0_i32_9 : i32
    scf.if %11 {
      %c0_10 = arith.constant 0 : index
      %c0_11 = arith.constant 0 : index
      %12 = vector.load %arg9[%c0_10, %c0_11] : memref<16x32xf32, #tpu.memory_space<vmem>>, vector<16x32xf32>
      %c0_12 = arith.constant 0 : index
      %c0_13 = arith.constant 0 : index
      %13 = vector.load %arg4[%c0_12, %c0_13] : memref<1x32xf32, #tpu.memory_space<vmem>>, vector<1x32xf32>
      %14 = vector.broadcast %13 : vector<1x32xf32> to vector<16x32xf32>
      %15 = arith.addf %12, %14 : vector<16x32xf32>
      %c0_14 = arith.constant 0 : index
      %c0_15 = arith.constant 0 : index
      %16 = vector.load %arg5[%c0_14, %c0_15] : memref<16x32xbf16, #tpu.memory_space<vmem>>, vector<16x32xbf16>
      %17 = arith.extf %16 : vector<16x32xbf16> to vector<16x32xf32>
      %18 = arith.addf %15, %17 : vector<16x32xf32>
      %c0_16 = arith.constant 0 : index
      %c0_17 = arith.constant 0 : index
      %19 = vector.load %arg6[%c0_16, %c0_17] : memref<1x32xf32, #tpu.memory_space<vmem>>, vector<1x32xf32>
      %c0_18 = arith.constant 0 : index
      %c0_19 = arith.constant 0 : index
      %20 = vector.load %arg7[%c0_18, %c0_19] : memref<1x32xf32, #tpu.memory_space<vmem>>, vector<1x32xf32>
      %cst_20 = arith.constant dense<0.000000e+00> : vector<16xf32>
      %21 = vector.multi_reduction <add>, %18, %cst_20 [1] : vector<16x32xf32> to vector<16xf32>
      %22 = vector.shape_cast %21 : vector<16xf32> to vector<16x1xf32>
      %cst_21 = arith.constant 3.200000e+01 : f32
      %23 = vector.broadcast %cst_21 : f32 to vector<16x1xf32>
      %24 = arith.divf %22, %23 : vector<16x1xf32>
      %25 = arith.mulf %18, %18 : vector<16x32xf32>
      %cst_22 = arith.constant dense<0.000000e+00> : vector<16xf32>
      %26 = vector.multi_reduction <add>, %25, %cst_22 [1] : vector<16x32xf32> to vector<16xf32>
      %27 = vector.shape_cast %26 : vector<16xf32> to vector<16x1xf32>
      %cst_23 = arith.constant 3.200000e+01 : f32
      %28 = vector.broadcast %cst_23 : f32 to vector<16x1xf32>
      %29 = arith.divf %27, %28 : vector<16x1xf32>
      %30 = arith.mulf %24, %24 : vector<16x1xf32>
      %31 = arith.subf %29, %30 : vector<16x1xf32>
      %32 = vector.broadcast %24 : vector<16x1xf32> to vector<16x32xf32>
      %33 = arith.subf %18, %32 : vector<16x32xf32>
      %cst_24 = arith.constant 9.99999974E-6 : f32
      %34 = vector.broadcast %cst_24 : f32 to vector<16x1xf32>
      %35 = arith.addf %31, %34 : vector<16x1xf32>
      %36 = math.rsqrt %35 : vector<16x1xf32>
      %37 = vector.broadcast %36 : vector<16x1xf32> to vector<16x32xf32>
      %38 = arith.mulf %33, %37 : vector<16x32xf32>
      %39 = vector.broadcast %19 : vector<1x32xf32> to vector<16x32xf32>
      %40 = arith.mulf %38, %39 : vector<16x32xf32>
      %41 = vector.broadcast %20 : vector<1x32xf32> to vector<16x32xf32>
      %42 = arith.addf %40, %41 : vector<16x32xf32>
      %43 = arith.truncf %42 : vector<16x32xf32> to vector<16x32xbf16>
      %c0_25 = arith.constant 0 : index
      %c0_26 = arith.constant 0 : index
      %44 = vector.load %arg8[%c0_25, %c0_26] : memref<16x32xbf16, #tpu.memory_space<vmem>>, vector<16x32xbf16>
      tpu.vector_store %arg8[%c0_25, %c0_26], %43 {strides = array<i32>} : memref<16x32xbf16, #tpu.memory_space<vmem>>, vector<16x32xbf16>,
    } else {
    }
    return
  }
  func.func @transform_0(%arg0: i32, %arg1: i32) -> (i32, i32) {
    %c0_i32 = arith.constant 0 : i32
    return %arg0, %arg1 : i32, i32
  }
  func.func @transform_1(%arg0: i32, %arg1: i32) -> (i32, i32) {
    %c0_i32 = arith.constant 0 : i32
    %c0_i32_0 = arith.constant 0 : i32
    return %arg1, %c0_i32 : i32, i32
  }
  func.func @transform_2(%arg0: i32, %arg1: i32) -> (i32, i32) {
    %c0_i32 = arith.constant 0 : i32
    %c0_i32_0 = arith.constant 0 : i32
    %c0_i32_1 = arith.constant 0 : i32
    return %c0_i32, %c0_i32_0 : i32, i32
  }
  func.func @transform_3(%arg0: i32, %arg1: i32) -> (i32, i32) {
    %c0_i32 = arith.constant 0 : i32
    %c0_i32_0 = arith.constant 0 : i32
    return %arg0, %c0_i32 : i32, i32
  }
  func.func @transform_4(%arg0: i32, %arg1: i32) -> (i32, i32) {
    %c0_i32 = arith.constant 0 : i32
    %c0_i32_0 = arith.constant 0 : i32
    %c0_i32_1 = arith.constant 0 : i32
    return %c0_i32, %c0_i32_0 : i32, i32
  }
  func.func @transform_5(%arg0: i32, %arg1: i32) -> (i32, i32) {
    %c0_i32 = arith.constant 0 : i32
    %c0_i32_0 = arith.constant 0 : i32
    %c0_i32_1 = arith.constant 0 : i32
    return %c0_i32, %c0_i32_0 : i32, i32
  }
  func.func @transform_6(%arg0: i32, %arg1: i32) -> (i32, i32) {
    %c0_i32 = arith.constant 0 : i32
    %c0_i32_0 = arith.constant 0 : i32
    return %arg0, %c0_i32 : i32, i32
  }
}

module attributes {stable_mosaic.version = 11 : i64} {
  func.func @_ln_kernel(%arg0: i32, %arg1: memref<16x32xbf16, #tpu.memory_space<vmem>>, %arg2: memref<1x32xf32, #tpu.memory_space<vmem>>, %arg3: memref<1x32xf32, #tpu.memory_space<vmem>>, %arg4: memref<16x32xf32, #tpu.memory_space<vmem>>) attributes {dimension_semantics = [#tpu.dimension_semantics<parallel>], iteration_bounds = array<i64: 1>, scalar_prefetch = 0 : i64, scratch_operands = 0 : i64, tpu.core_type = #tpu.core_type<tc>, window_params = [{transform_indices = @transform_0, window_bounds = array<i64: 16, 32>}, {pipeline_mode = #tpu.pipeline_mode<synchronous>, transform_indices = @transform_1, window_bounds = array<i64: 1, 32>}, {pipeline_mode = #tpu.pipeline_mode<synchronous>, transform_indices = @transform_2, window_bounds = array<i64: 1, 32>}, {transform_indices = @transform_3, window_bounds = array<i64: 16, 32>}]} {
    %c0 = arith.constant 0 : index
    %c0_0 = arith.constant 0 : index
    %0 = vector.load %arg1[%c0, %c0_0] : memref<16x32xbf16, #tpu.memory_space<vmem>>, vector<16x32xbf16>
    %1 = arith.extf %0 : vector<16x32xbf16> to vector<16x32xf32>
    %c0_1 = arith.constant 0 : index
    %c0_2 = arith.constant 0 : index
    %2 = vector.load %arg2[%c0_1, %c0_2] : memref<1x32xf32, #tpu.memory_space<vmem>>, vector<1x32xf32>
    %c0_3 = arith.constant 0 : index
    %c0_4 = arith.constant 0 : index
    %3 = vector.load %arg3[%c0_3, %c0_4] : memref<1x32xf32, #tpu.memory_space<vmem>>, vector<1x32xf32>
    %cst = arith.constant dense<0.000000e+00> : vector<16xf32>
    %4 = vector.multi_reduction <add>, %1, %cst [1] : vector<16x32xf32> to vector<16xf32>
    %5 = vector.shape_cast %4 : vector<16xf32> to vector<16x1xf32>
    %cst_5 = arith.constant 3.200000e+01 : f32
    %6 = vector.broadcast %cst_5 : f32 to vector<16x1xf32>
    %7 = arith.divf %5, %6 : vector<16x1xf32>
    %8 = arith.mulf %1, %1 : vector<16x32xf32>
    %cst_6 = arith.constant dense<0.000000e+00> : vector<16xf32>
    %9 = vector.multi_reduction <add>, %8, %cst_6 [1] : vector<16x32xf32> to vector<16xf32>
    %10 = vector.shape_cast %9 : vector<16xf32> to vector<16x1xf32>
    %cst_7 = arith.constant 3.200000e+01 : f32
    %11 = vector.broadcast %cst_7 : f32 to vector<16x1xf32>
    %12 = arith.divf %10, %11 : vector<16x1xf32>
    %13 = arith.mulf %7, %7 : vector<16x1xf32>
    %14 = arith.subf %12, %13 : vector<16x1xf32>
    %15 = vector.broadcast %7 : vector<16x1xf32> to vector<16x32xf32>
    %16 = arith.subf %1, %15 : vector<16x32xf32>
    %cst_8 = arith.constant 9.99999974E-6 : f32
    %17 = vector.broadcast %cst_8 : f32 to vector<16x1xf32>
    %18 = arith.addf %14, %17 : vector<16x1xf32>
    %19 = math.rsqrt %18 : vector<16x1xf32>
    %20 = vector.broadcast %19 : vector<16x1xf32> to vector<16x32xf32>
    %21 = arith.mulf %16, %20 : vector<16x32xf32>
    %22 = vector.broadcast %2 : vector<1x32xf32> to vector<16x32xf32>
    %23 = arith.mulf %21, %22 : vector<16x32xf32>
    %24 = vector.broadcast %3 : vector<1x32xf32> to vector<16x32xf32>
    %25 = arith.addf %23, %24 : vector<16x32xf32>
    %c0_9 = arith.constant 0 : index
    %c0_10 = arith.constant 0 : index
    %26 = vector.load %arg4[%c0_9, %c0_10] : memref<16x32xf32, #tpu.memory_space<vmem>>, vector<16x32xf32>
    tpu.vector_store %arg4[%c0_9, %c0_10], %25 {strides = array<i32>} : memref<16x32xf32, #tpu.memory_space<vmem>>, vector<16x32xf32>,
    return
  }
  func.func @transform_0(%arg0: i32) -> (i32, i32) {
    %c0_i32 = arith.constant 0 : i32
    %c0_i32_0 = arith.constant 0 : i32
    return %arg0, %c0_i32 : i32, i32
  }
  func.func @transform_1(%arg0: i32) -> (i32, i32) {
    %c0_i32 = arith.constant 0 : i32
    %c0_i32_0 = arith.constant 0 : i32
    %c0_i32_1 = arith.constant 0 : i32
    return %c0_i32, %c0_i32_0 : i32, i32
  }
  func.func @transform_2(%arg0: i32) -> (i32, i32) {
    %c0_i32 = arith.constant 0 : i32
    %c0_i32_0 = arith.constant 0 : i32
    %c0_i32_1 = arith.constant 0 : i32
    return %c0_i32, %c0_i32_0 : i32, i32
  }
  func.func @transform_3(%arg0: i32) -> (i32, i32) {
    %c0_i32 = arith.constant 0 : i32
    %c0_i32_0 = arith.constant 0 : i32
    return %arg0, %c0_i32 : i32, i32
  }
}

module attributes {stable_mosaic.version = 11 : i64} {
  func.func @_matmul_res_ln_kernel(%arg0: i32, %arg1: i32, %arg2: memref<16x64xbf16, #tpu.memory_space<vmem>>, %arg3: memref<64x32xbf16, #tpu.memory_space<vmem>>, %arg4: memref<1x32xf32, #tpu.memory_space<vmem>>, %arg5: memref<16x32xbf16, #tpu.memory_space<vmem>>, %arg6: memref<1x32xf32, #tpu.memory_space<vmem>>, %arg7: memref<1x32xf32, #tpu.memory_space<vmem>>, %arg8: memref<16x32xbf16, #tpu.memory_space<vmem>>, %arg9: memref<16x32xf32, #tpu.memory_space<vmem>>) attributes {dimension_semantics = [#tpu.dimension_semantics<parallel>, #tpu.dimension_semantics<arbitrary>], iteration_bounds = array<i64: 1, 1>, scalar_prefetch = 0 : i64, scratch_operands = 1 : i64, tpu.core_type = #tpu.core_type<tc>, window_params = [{transform_indices = @transform_0, window_bounds = array<i64: 16, 64>}, {transform_indices = @transform_1, window_bounds = array<i64: 64, 32>}, {pipeline_mode = #tpu.pipeline_mode<synchronous>, transform_indices = @transform_2, window_bounds = array<i64: 1, 32>}, {transform_indices = @transform_3, window_bounds = array<i64: 16, 32>}, {pipeline_mode = #tpu.pipeline_mode<synchronous>, transform_indices = @transform_4, window_bounds = array<i64: 1, 32>}, {pipeline_mode = #tpu.pipeline_mode<synchronous>, transform_indices = @transform_5, window_bounds = array<i64: 1, 32>}, {transform_indices = @transform_6, window_bounds = array<i64: 16, 32>}]} {
    %c0_i32 = arith.constant 0 : i32
    %0 = arith.cmpi eq, %arg1, %c0_i32 : i32
    %1 = arith.extui %0 : i1 to i32
    %c0_i32_0 = arith.constant 0 : i32
    %2 = arith.cmpi ne, %1, %c0_i32_0 : i32
    scf.if %2 {
      %cst_10 = arith.constant 0.000000e+00 : f32
      %12 = vector.broadcast %cst_10 : f32 to vector<16x32xf32>
      %c0_11 = arith.constant 0 : index
      %c0_12 = arith.constant 0 : index
      %13 = vector.load %arg9[%c0_11, %c0_12] : memref<16x32xf32, #tpu.memory_space<vmem>>, vector<16x32xf32>
      tpu.vector_store %arg9[%c0_11, %c0_12], %12 {strides = array<i32>} : memref<16x32xf32, #tpu.memory_space<vmem>>, vector<16x32xf32>,
    } else {
    }
    %c0 = arith.constant 0 : index
    %c0_1 = arith.constant 0 : index
    %3 = vector.load %arg9[%c0, %c0_1] : memref<16x32xf32, #tpu.memory_space<vmem>>, vector<16x32xf32>
    %c0_2 = arith.constant 0 : index
    %c0_3 = arith.constant 0 : index
    %4 = vector.load %arg2[%c0_2, %c0_3] : memref<16x64xbf16, #tpu.memory_space<vmem>>, vector<16x64xbf16>
    %c0_4 = arith.constant 0 : index
    %c0_5 = arith.constant 0 : index
    %5 = vector.load %arg3[%c0_4, %c0_5] : memref<64x32xbf16, #tpu.memory_space<vmem>>, vector<64x32xbf16>
    %cst = arith.constant dense<0.000000e+00> : vector<16x32xf32>
    %6 = tpu.matmul %4, %5, %cst {dimension_numbers = #tpu.dot_dimension_numbers<[1], [0], [0], [1], [0, 0, 1, 1], [], []>} : vector<16x64xbf16>, vector<64x32xbf16>, vector<16x32xf32> -> vector<16x32xf32>
    %7 = arith.addf %3, %6 : vector<16x32xf32>
    %c0_6 = arith.constant 0 : index
    %c0_7 = arith.constant 0 : index
    %8 = vector.load %arg9[%c0_6, %c0_7] : memref<16x32xf32, #tpu.memory_space<vmem>>, vector<16x32xf32>
    tpu.vector_store %arg9[%c0_6, %c0_7], %7 {strides = array<i32>} : memref<16x32xf32, #tpu.memory_space<vmem>>, vector<16x32xf32>,
    %c0_i32_8 = arith.constant 0 : i32
    %9 = arith.cmpi eq, %arg1, %c0_i32_8 : i32
    %10 = arith.extui %9 : i1 to i32
    %c0_i32_9 = arith.constant 0 : i32
    %11 = arith.cmpi ne, %10, %c0_i32_9 : i32
    scf.if %11 {
      %c0_10 = arith.constant 0 : index
      %c0_11 = arith.constant 0 : index
      %12 = vector.load %arg9[%c0_10, %c0_11] : memref<16x32xf32, #tpu.memory_space<vmem>>, vector<16x32xf32>
      %c0_12 = arith.constant 0 : index
      %c0_13 = arith.constant 0 : index
      %13 = vector.load %arg4[%c0_12, %c0_13] : memref<1x32xf32, #tpu.memory_space<vmem>>, vector<1x32xf32>
      %14 = vector.broadcast %13 : vector<1x32xf32> to vector<16x32xf32>
      %15 = arith.addf %12, %14 : vector<16x32xf32>
      %c0_14 = arith.constant 0 : index
      %c0_15 = arith.constant 0 : index
      %16 = vector.load %arg5[%c0_14, %c0_15] : memref<16x32xbf16, #tpu.memory_space<vmem>>, vector<16x32xbf16>
      %17 = arith.extf %16 : vector<16x32xbf16> to vector<16x32xf32>
      %18 = arith.addf %15, %17 : vector<16x32xf32>
      %c0_16 = arith.constant 0 : index
      %c0_17 = arith.constant 0 : index
      %19 = vector.load %arg6[%c0_16, %c0_17] : memref<1x32xf32, #tpu.memory_space<vmem>>, vector<1x32xf32>
      %c0_18 = arith.constant 0 : index
      %c0_19 = arith.constant 0 : index
      %20 = vector.load %arg7[%c0_18, %c0_19] : memref<1x32xf32, #tpu.memory_space<vmem>>, vector<1x32xf32>
      %cst_20 = arith.constant dense<0.000000e+00> : vector<16xf32>
      %21 = vector.multi_reduction <add>, %18, %cst_20 [1] : vector<16x32xf32> to vector<16xf32>
      %22 = vector.shape_cast %21 : vector<16xf32> to vector<16x1xf32>
      %cst_21 = arith.constant 3.200000e+01 : f32
      %23 = vector.broadcast %cst_21 : f32 to vector<16x1xf32>
      %24 = arith.divf %22, %23 : vector<16x1xf32>
      %25 = arith.mulf %18, %18 : vector<16x32xf32>
      %cst_22 = arith.constant dense<0.000000e+00> : vector<16xf32>
      %26 = vector.multi_reduction <add>, %25, %cst_22 [1] : vector<16x32xf32> to vector<16xf32>
      %27 = vector.shape_cast %26 : vector<16xf32> to vector<16x1xf32>
      %cst_23 = arith.constant 3.200000e+01 : f32
      %28 = vector.broadcast %cst_23 : f32 to vector<16x1xf32>
      %29 = arith.divf %27, %28 : vector<16x1xf32>
      %30 = arith.mulf %24, %24 : vector<16x1xf32>
      %31 = arith.subf %29, %30 : vector<16x1xf32>
      %32 = vector.broadcast %24 : vector<16x1xf32> to vector<16x32xf32>
      %33 = arith.subf %18, %32 : vector<16x32xf32>
      %cst_24 = arith.constant 9.99999974E-6 : f32
      %34 = vector.broadcast %cst_24 : f32 to vector<16x1xf32>
      %35 = arith.addf %31, %34 : vector<16x1xf32>
      %36 = math.rsqrt %35 : vector<16x1xf32>
      %37 = vector.broadcast %36 : vector<16x1xf32> to vector<16x32xf32>
      %38 = arith.mulf %33, %37 : vector<16x32xf32>
      %39 = vector.broadcast %19 : vector<1x32xf32> to vector<16x32xf32>
      %40 = arith.mulf %38, %39 : vector<16x32xf32>
      %41 = vector.broadcast %20 : vector<1x32xf32> to vector<16x32xf32>
      %42 = arith.addf %40, %41 : vector<16x32xf32>
      %43 = arith.truncf %42 : vector<16x32xf32> to vector<16x32xbf16>
      %c0_25 = arith.constant 0 : index
      %c0_26 = arith.constant 0 : index
      %44 = vector.load %arg8[%c0_25, %c0_26] : memref<16x32xbf16, #tpu.memory_space<vmem>>, vector<16x32xbf16>
      tpu.vector_store %arg8[%c0_25, %c0_26], %43 {strides = array<i32>} : memref<16x32xbf16, #tpu.memory_space<vmem>>, vector<16x32xbf16>,
    } else {
    }
    return
  }
  func.func @transform_0(%arg0: i32, %arg1: i32) -> (i32, i32) {
    %c0_i32 = arith.constant 0 : i32
    return %arg0, %arg1 : i32, i32
  }
  func.func @transform_1(%arg0: i32, %arg1: i32) -> (i32, i32) {
    %c0_i32 = arith.constant 0 : i32
    %c0_i32_0 = arith.constant 0 : i32
    return %arg1, %c0_i32 : i32, i32
  }
  func.func @transform_2(%arg0: i32, %arg1: i32) -> (i32, i32) {
    %c0_i32 = arith.constant 0 : i32
    %c0_i32_0 = arith.constant 0 : i32
    %c0_i32_1 = arith.constant 0 : i32
    return %c0_i32, %c0_i32_0 : i32, i32
  }
  func.func @transform_3(%arg0: i32, %arg1: i32) -> (i32, i32) {
    %c0_i32 = arith.constant 0 : i32
    %c0_i32_0 = arith.constant 0 : i32
    return %arg0, %c0_i32 : i32, i32
  }
  func.func @transform_4(%arg0: i32, %arg1: i32) -> (i32, i32) {
    %c0_i32 = arith.constant 0 : i32
    %c0_i32_0 = arith.constant 0 : i32
    %c0_i32_1 = arith.constant 0 : i32
    return %c0_i32, %c0_i32_0 : i32, i32
  }
  func.func @transform_5(%arg0: i32, %arg1: i32) -> (i32, i32) {
    %c0_i32 = arith.constant 0 : i32
    %c0_i32_0 = arith.constant 0 : i32
    %c0_i32_1 = arith.constant 0 : i32
    return %c0_i32, %c0_i32_0 : i32, i32
  }
  func.func @transform_6(%arg0: i32, %arg1: i32) -> (i32, i32) {
    %c0_i32 = arith.constant 0 : i32
    %c0_i32_0 = arith.constant 0 : i32
    return %arg0, %c0_i32 : i32, i32
  }
}

</mosaic_0001>

<bundles_post_ra>
// kernel: encoder_forward.11
= control target key start
LH: loop header
LB: loop body
LE: loop exit
PB: predicated region body
PF: predicated region fallthrough
CT: control target
= control target key end

     0   :  { %vm19_vm0 = vcmask 785408   ;;  %v151_v0 = vmov 0.0   ;;  %vm152_vm1 = vmmov 0   ;;  %vm47_vm2 = vcmask 261120   ;;  %s195_s1 = inlined_call_operand.vmem [shape: bf16[32,96], index: 1, kind: input, shape index: {}]   ;;  %s196_s0 = inlined_call_operand.vmem [shape: bf16[16,32], index: 0, kind: input, shape index: {}]   ;;  %s197_s2 = inlined_call_operand.vmem [shape: f32[1,96], index: 2, kind: input, shape index: {}]   ;;  %s198_s3 = inlined_call_operand.vmem [shape: bf16[16,96], index: 3, kind: output, shape index: {}]  }
   0x1   :  { %138 = vmatprep.subr.bf16.mxu0 %v151_v0  ;;  %v148_v1 = vld [vmem:[%s195_s1] sm:$0xff]   ;;  %142 = vmatprep.mubr.msk.bf16.mxu0 %vm152_vm1, %v151_v0  ;;  %20 = vst.msk [vmem:[#allocation2] sm:$0xff] %vm19_vm0, %v151_v0  ;;  %21 = vst.msk [vmem:[#allocation2 + $0x8] sm:$0xff] %vm19_vm0, %v151_v0  ;;  %v149_v2 = vld [vmem:[%s195_s1 + $0x8] sm:$0xff]   ;;  %vm119_vm3 = vcmask 781312  }
   0x2   :  { %139 = vmatpush3.bf16.msra.mxu0 %v148_v1  ;;  %v150_v3 = vld [vmem:[%s196_s0] sm:$0xff]  }
   0x3   :  { %140 = vmatprep.subr.bf16.mxu0 %v151_v0  ;;  %v130_v12 = vld [vmem:[%s197_s2] ss:$0 sm:$0xff] }
   0x6   :  { %141 = vmatpush3.bf16.msra.mxu0 %v149_v2 }
   0x8   :  { %v22_v4 = vld [vmem:[#allocation2] sm:$0xff]  ;;  %v23_v6 = vld [vmem:[#allocation2 + $0x8] sm:$0xff] }
   0x9   :  { %143 = vmatmul.mubr.msk.bf16.vlgmr.msra.gmra.mrb[0].mxu0 %vm47_vm2, %v150_v3 }
  0xdc   :  { %v85_v5 = vpop.f32.mrb[0].mxu0 }
  0xdd   :  { %v92_v7 = vadd.f32 %v85_v5, %v22_v4  ;;  %v144_v8 = vpop.f32.mrb[1].mxu0 }
  0xde   :  { %v88_v9 = vpop.f32.mrb[2].mxu0 }
  0xdf   :  { %95 = vst.msk [vmem:[#allocation2] sm:$0xff] %vm19_vm0, %v92_v7  ;;  %v93_v10 = vadd.f32 %v88_v9, %v23_v6  ;;  %v145_v11 = vpop.f32.mrb[3].mxu0 }
  0xe1   :  { %96 = vst.msk [vmem:[#allocation2 + $0x8] sm:$0xff] %vm19_vm0, %v93_v10 }
  0xe6   :  { %v100_v13 = vld [vmem:[#allocation2] sm:$0xff] }
  0xe7   :  { %v109_v14 = vadd.f32 %v130_v12, %v100_v13 }
  0xe8   :  { %v101_v15 = vld [vmem:[#allocation2 + $0x8] sm:$0xff] }
  0xe9   :  { %v133_v16 = vpack.c.bf16 %v109_v14, %v109_v14  ;;  %v110_v17 = vadd.f32 %v130_v12, %v101_v15 }
  0xeb   :  { %120 = vst.msk [vmem:[%s198_s3] sm:$0xf] %vm119_vm3, %v133_v16  ;;  %v134_v18 = vpack.c.bf16 %v110_v17, %v110_v17 }
  0xed   :  { %121 = vst.msk [vmem:[%s198_s3 + $0x4] sm:$0xf] %vm119_vm3, %v134_v18 }

// kernel: encoder_forward.14
= control target key start
LH: loop header
LB: loop body
LE: loop exit
PB: predicated region body
PF: predicated region fallthrough
CT: control target
= control target key end

     0   :  { %vm19_vm0 = vcmask 523264   ;;  %v153_v0 = vmov 0.0   ;;  %vm154_vm1 = vmmov 0   ;;  %vm47_vm2 = vcmask 261120   ;;  %s197_s1 = inlined_call_operand.vmem [shape: bf16[32,64], index: 1, kind: input, shape index: {}]   ;;  %s198_s0 = inlined_call_operand.vmem [shape: bf16[16,32], index: 0, kind: input, shape index: {}]   ;;  %s199_s2 = inlined_call_operand.vmem [shape: f32[1,64], index: 2, kind: input, shape index: {}]   ;;  %s200_s3 = inlined_call_operand.vmem [shape: bf16[16,64], index: 3, kind: output, shape index: {}]  }
   0x1   :  { %140 = vmatprep.subr.bf16.mxu0 %v153_v0  ;;  %v150_v1 = vld [vmem:[%s197_s1] sm:$0xff]   ;;  %144 = vmatprep.mubr.msk.bf16.mxu0 %vm154_vm1, %v153_v0  ;;  %20 = vst.msk [vmem:[#allocation2] sm:$0xff] %vm19_vm0, %v153_v0  ;;  %21 = vst.msk [vmem:[#allocation2 + $0x8] sm:$0xff] %vm19_vm0, %v153_v0  ;;  %v151_v2 = vld [vmem:[%s197_s1 + $0x8] sm:$0xff]   ;;  %vm121_vm3 = vcmask 519168  }
   0x2   :  { %141 = vmatpush3.bf16.msra.mxu0 %v150_v1  ;;  %v152_v3 = vld [vmem:[%s198_s0] sm:$0xff]  }
   0x3   :  { %142 = vmatprep.subr.bf16.mxu0 %v153_v0  ;;  %v132_v12 = vld [vmem:[%s199_s2] ss:$0 sm:$0xff] }
   0x6   :  { %143 = vmatpush3.bf16.msra.mxu0 %v151_v2 }
   0x8   :  { %v22_v4 = vld [vmem:[#allocation2] sm:$0xff]  ;;  %v23_v6 = vld [vmem:[#allocation2 + $0x8] sm:$0xff] }
   0x9   :  { %145 = vmatmul.mubr.msk.bf16.vlgmr.msra.gmra.mrb[0].mxu0 %vm47_vm2, %v152_v3 }
  0xdc   :  { %v85_v5 = vpop.f32.mrb[0].mxu0 }
  0xdd   :  { %v92_v7 = vadd.f32 %v85_v5, %v22_v4  ;;  %v146_v8 = vpop.f32.mrb[1].mxu0 }
  0xde   :  { %v88_v9 = vpop.f32.mrb[2].mxu0 }
  0xdf   :  { %95 = vst.msk [vmem:[#allocation2] sm:$0xff] %vm19_vm0, %v92_v7  ;;  %v93_v10 = vadd.f32 %v88_v9, %v23_v6  ;;  %v147_v11 = vpop.f32.mrb[3].mxu0 }
  0xe1   :  { %96 = vst.msk [vmem:[#allocation2 + $0x8] sm:$0xff] %vm19_vm0, %v93_v10 }
  0xe6   :  { %v100_v13 = vld [vmem:[#allocation2] sm:$0xff] }
  0xe7   :  { %v109_v14 = vadd.f32 %v132_v12, %v100_v13 }
  0xe8   :  { %v101_v15 = vld [vmem:[#allocation2 + $0x8] sm:$0xff] }
  0xe9   :  { %v111_v16 = vmax.f32 %v109_v14, 0.0  ;;  %v110_v17 = vadd.f32 %v132_v12, %v101_v15 }
  0xeb   :  { %v135_v18 = vpack.c.bf16 %v111_v16, %v111_v16  ;;  %v112_v19 = vmax.f32 %v110_v17, 0.0 }
  0xed   :  { %122 = vst.msk [vmem:[%s200_s3] sm:$0xf] %vm121_vm3, %v135_v18  ;;  %v136_v20 = vpack.c.bf16 %v112_v19, %v112_v19 }
  0xef   :  { %123 = vst.msk [vmem:[%s200_s3 + $0x4] sm:$0xf] %vm121_vm3, %v136_v20 }

// kernel: encoder_forward.12
= control target key start
LH: loop header
LB: loop body
LE: loop exit
PB: predicated region body
PF: predicated region fallthrough
CT: control target
= control target key end

     0   :  { %s856_s9 = smov 0   ;;  %s957_s0 = inlined_call_operand.vmem [shape: bf16[2,8,96], index: 0, kind: input, shape index: {}]   ;;  %s958_s1 = inlined_call_operand.vmem [shape: f32[2,1,8], index: 1, kind: input, shape index: {}]   ;;  %s959_s2 = inlined_call_operand.vmem [shape: bf16[2,8,32], index: 2, kind: output, shape index: {}]  }
   0x1 LB: > { %s692_s10 = sadd.s32 4294967295, %s823_s9   ;;  %p696_p0 = scmp.ge.s32.totalorder %s823_s9, 1  ;;  %s823_s9 = sphi %s856_s9, %s12_s9  }
   0x2   : > { %p119_p1 = scmp.lt.s32.totalorder %s823_s9, 3 }
   0x4   : > { %p120_p2 = pnand %p696_p0, %p119_p1 }
   0x5   : > { %p142_p3 = scmp.lt.s32.totalorder (!%p120_p2), %s692_s10, 1  ;;  %v825_v0 = vmov (!%p120_p2), 0.0   ;;  %vm826_vm0 = vmmov (!%p120_p2), 0   ;;  %s827_s15 = smov (!%p120_p2), 96   ;;  %vm169_vm1 = vcmask (!%p120_p2), 64512   ;;  %vm231_vm2 = vcmask (!%p120_p2), 1043456  }
   0x6   : > { %123 = sbr.rel (%p120_p2) target bundleno = 1247 (0x4df), region = 28  ;;  %728 = vmatprep.subr.bf16.mxu0 (!%p120_p2), %v825_v0  ;;  %730 = vmatprep.mubr.msk.bf16.mxu0 (!%p120_p2), %vm826_vm0, %v825_v0  ;;  %s828_s16 = smov (!%p120_p2), 64   ;;  %vm623_vm3 = vcmask (!%p120_p2), 130048   ;;  %vm625_vm4 = vcmask (!%p120_p2), 195584   ;;  %vm628_vm5 = vcmask (!%p120_p2), 257024  }
   0x7   : > { %734 = vmatprep.subr.bf16.mxu1 (!%p120_p2), %v825_v0  ;;  %736 = vmatprep.mubr.msk.bf16.mxu1 (!%p120_p2), %vm826_vm0, %v825_v0  ;;  %s829_s17 = smov (!%p120_p2), 88   ;;  %s830_s18 = smov (!%p120_p2), 120  }
   0x8   : > { %s831_s19 = smov (!%p120_p2), 80   ;;  %s832_s20 = smov (!%p120_p2), 112  }
   0x9   : > { %s833_s21 = smov (!%p120_p2), 72   ;;  %s834_s22 = smov (!%p120_p2), 104  }
   0xa   : > { %s835_s26 = smov (!%p120_p2), 56   ;;  %s836_s27 = smov (!%p120_p2), 48  }
   0xb   : > { %s837_s28 = smov (!%p120_p2), 40   ;;  %s838_s29 = smov (!%p120_p2), 8  }
   0xc   : > { %s839_s30 = smov (!%p120_p2), 16   ;;  %s840_s3 = smov (!%p120_p2), 24  }
   0xd   : > { %s961_s10 = smov (!%p142_p3, %s692_s10), 1 }
   0xe   : > { %s697_s11 = sshll.u32 %s961_s10, 2  ;;  %s148_s25 = scalar_lea.vmem %s958_s1, %s961_s10 }
   0xf   : > { %s145_s14 = scalar_lea.vmem %s957_s0, %s697_s11  ;;  %v894_v7 = vld [vmem:[%s148_s25] ss:$0 sm:$0xff]  ;;  %s152_s6 = scalar_lea.vmem %s959_s2, %s697_s11 }
  0x10   : > { %v155_v1 = vld [vmem:[%s145_s14] sm:$0xf] }
  0x11   : > { %v878_v2 = vcombine.low %v155_v1, %v155_v1  ;;  %v157_v5 = vmul.bf16 1052065461, %v155_v1 }
  0x13   : > { %167 = vrot.lane.b32.xlu0 %v878_v2, %s827_s15  ;;  %226 = vrot.lane.b32.xlu1 %v878_v2, %s828_s16  ;;  %v703_v6 = vcombine.low %v157_v5, %v157_v5 }
  0x17   : > { %282 = vrot.lane.b32.xlu1 %v878_v2, %s829_s17 }
  0x1b   : > { %280 = vrot.lane.b32.xlu1 %v703_v6, %s830_s18 }
  0x1f   : > { %392 = vrot.lane.b32.xlu1 %v878_v2, %s831_s19 }
  0x23   : > { %390 = vrot.lane.b32.xlu1 %v703_v6, %s832_s20 }
  0x27   : > { %502 = vrot.lane.b32.xlu1 %v878_v2, %s833_s21 }
  0x2b   : > { %500 = vrot.lane.b32.xlu1 %v703_v6, %s834_s22 }
  0x85   : > { %v168_v3 = vpop.permute.xlu0 %167  ;;  %v227_v14 = vpop.permute.xlu1 %226 }
  0x86   : > { %v174_v4 = vsel %vm169_vm1, %v168_v3, 0  ;;  %v233_v15 = vsel %vm231_vm2, %v227_v14, 0 }
  0x87   : > { %729 = vmatpush3.bf16.xpose.msra.mxu0 %v174_v4  ;;  %735 = vmatpush3.bf16.msra.mxu1 %v233_v15 }
  0x88   : > { %746 = vmatprep.subr.bf16.mxu0 %v825_v0  ;;  %740 = vmatprep.subr.bf16.mxu1 %v825_v0 }
  0x89   : > { %v283_v19 = vpop.permute.xlu1 %282 }
  0x8a   : > { %v288_v22 = vsel %vm169_vm1, %v283_v19, 0 }
  0x8d   : > { %v281_v20 = vpop.permute.xlu1 %280 }
  0x8e   : > { %731 = vmatmul.mubr.msk.bf16.vlgmr.msra.gmra.mrb[0].mxu0 %vm169_vm1, %v157_v5 }
  0x8f   : > { %748 = vmatprep.mubr.msk.bf16.mxu0 %vm826_vm0, %v825_v0 }
  0x91   : > { %v393_v24 = vpop.permute.xlu1 %392 }
  0x92   : > { %v398_v26 = vsel %vm169_vm1, %v393_v24, 0 }
  0x95   : > { %v391_v25 = vpop.permute.xlu1 %390 }
  0x99   : > { %v503_v27 = vpop.permute.xlu1 %502 }
  0x9a   : > { %v508_v28 = vsel %vm169_vm1, %v503_v27, 0 }
  0x9d   : > { %v501_v29 = vpop.permute.xlu1 %500 }
 0x161   : > { %v210_v8 = vpop.f32.mrb[0].mxu0 }
 0x162   : > { %v211_v9 = vadd.f32 %v894_v7, %v210_v8  ;;  %v732_v10 = vpop.f32.mrb[1].mxu0 }
 0x163   : > { %v213_v11 = vpop.f32.mrb[2].mxu0 }
 0x164   : > { %v733_v12 = vpop.f32.mrb[3].mxu0  ;;  %v216_v13 = vsel %vm169_vm1, %v211_v9, -inf }
 0x165   : > { %217 = vmax.xlane.f32.xlu0 %v216_v13 }
 0x17b   : > { %340 = vrot.lane.b32.xlu0 %v878_v2, %s835_s26 }
 0x1f2   : > { %v218_v16 = vpop.xlane.xlu0 %217 }
 0x1f3   : > { %v219_v17 = vsub.f32 %v211_v9, %v218_v16 }
 0x1f5   : > { %v220_v18 = vmul.f32 1.442695, %v219_v17 }
 0x1f6   : > { %v341_v30 = vpop.permute.xlu0 %340 }
 0x1f7   : > { %801 = vpow2.f32 %v220_v18  ;;  %v346_v31 = vsel %vm231_vm2, %v341_v30, 0 }
 0x1f8   : > { %747 = vmatpush3.bf16.msra.mxu0 %v346_v31 }
 0x1f9   : > { %758 = vmatprep.subr.bf16.mxu0 %v825_v0 }
 0x201   : > { %v901_v21 = vpop.eup %801 }
 0x202   : > { %v225_v23 = vpack.c.bf16 %v901_v21, %v901_v21  ;;  %v222_v13 = vsel %vm169_vm1, %v901_v21, 0.0 }
 0x204   : > { %737 = vmatmul.mubr.msk.bf16.vlgmr.msra.gmra.mrb[0].mxu1 %vm169_vm1, %v225_v23 }
 0x205   : > { %741 = vmatpush3.bf16.xpose.msra.mxu1 %v288_v22  ;;  %742 = vmatprep.mubr.msk.bf16.mxu1 %vm826_vm0, %v825_v0 }
 0x206   : > { %752 = vmatprep.subr.bf16.mxu1 %v825_v0 }
 0x20c   : > { %743 = vmatmul.mubr.msk.bf16.vlgmr.msra.gmra.mrb[4].mxu1 %vm169_vm1, %v281_v20 }
 0x20d   : > { %753 = vmatpush3.bf16.xpose.msra.mxu1 %v398_v26  ;;  %754 = vmatprep.mubr.msk.bf16.mxu1 %vm826_vm0, %v825_v0 }
 0x20e   : > { %764 = vmatprep.subr.bf16.mxu1 %v825_v0 }
 0x214   : > { %755 = vmatmul.mubr.msk.bf16.vlgmr.msra.gmra.mrb[8].mxu1 %vm169_vm1, %v391_v25 }
 0x215   : > { %765 = vmatpush3.bf16.xpose.msra.mxu1 %v508_v28  ;;  %766 = vmatprep.mubr.msk.bf16.mxu1 %vm826_vm0, %v825_v0 }
 0x21c   : > { %767 = vmatmul.mubr.msk.bf16.vlgmr.msra.gmra.mrb[12].mxu1 %vm169_vm1, %v501_v29 }
 0x2d7   : > { %v922_v32 = vpop.f32.mrb[0].mxu1 }
 0x2d8   : > { %v738_v33 = vpop.f32.mrb[1].mxu1 }
 0x2d9   : > { %v272_v34 = vpop.f32.mrb[2].mxu1 }
 0x2da   : > { %v739_v35 = vpop.f32.mrb[3].mxu1 }
 0x2df   : > { %v324_v36 = vpop.f32.mrb[4].mxu1 }
 0x2e0   : > { %v325_v37 = vadd.f32 %v894_v7, %v324_v36  ;;  %v744_v38 = vpop.f32.mrb[5].mxu1 }
 0x2e1   : > { %v327_v39 = vpop.f32.mrb[6].mxu1 }
 0x2e2   : > { %v745_v40 = vpop.f32.mrb[7].mxu1  ;;  %v330_v41 = vsel %vm169_vm1, %v325_v37, -inf }
 0x2e3   : > { %331 = vmax.xlane.f32.xlu1 %v330_v41 }
 0x2e7   : > { %v434_v42 = vpop.f32.mrb[8].mxu1 }
 0x2e8   : > { %v435_v43 = vadd.f32 %v894_v7, %v434_v42  ;;  %v756_v44 = vpop.f32.mrb[9].mxu1 }
 0x2e9   : > { %v437_v45 = vpop.f32.mrb[10].mxu1 }
 0x2ea   : > { %v757_v46 = vpop.f32.mrb[11].mxu1  ;;  %v440_v47 = vsel %vm169_vm1, %v435_v43, -inf }
 0x2eb   : > { %441 = vmax.xlane.f32.xlu0 %v440_v47 }
 0x2ef   : > { %v544_v48 = vpop.f32.mrb[12].mxu1 }
 0x2f0   : > { %v545_v49 = vadd.f32 %v894_v7, %v544_v48  ;;  %v768_v50 = vpop.f32.mrb[13].mxu1 }
 0x2f1   : > { %v547_v51 = vpop.f32.mrb[14].mxu1 }
 0x2f2   : > { %v769_v52 = vpop.f32.mrb[15].mxu1  ;;  %v550_v53 = vsel %vm169_vm1, %v545_v49, -inf }
 0x2f3   : > { %551 = vmax.xlane.f32.xlu0 %v550_v53 }
 0x2f4   : > { %450 = vrot.lane.b32.xlu1 %v878_v2, %s836_s27 }
 0x309   : > { %560 = vrot.lane.b32.xlu0 %v878_v2, %s837_s28 }
 0x370   : > { %v332_v54 = vpop.xlane.xlu1 %331 }
 0x371   : > { %v333_v55 = vsub.f32 %v325_v37, %v332_v54 }
 0x373   : > { %v334_v56 = vmul.f32 1.442695, %v333_v55 }
 0x374   : > { %v451_v60 = vpop.permute.xlu1 %450 }
 0x375   : > { %803 = vpow2.f32 %v334_v56  ;;  %v456_v62 = vsel %vm231_vm2, %v451_v60, 0 }
 0x378   : > { %v442_v57 = vpop.xlane.xlu0 %441 }
 0x379   : > { %v443_v58 = vsub.f32 %v435_v43, %v442_v57 }
 0x37b   : > { %v444_v59 = vmul.f32 1.442695, %v443_v58 }
 0x37d   : > { %805 = vpow2.f32 %v444_v59 }
 0x37f   : > { %v804_v61 = vpop.eup %803 }
 0x380   : > { %v552_v63 = vpop.xlane.xlu0 %551  ;;  %v336_v1 = vsel %vm169_vm1, %v804_v61, 0.0  ;;  %v339_v3 = vpack.c.bf16 %v804_v61, %v804_v61 }
 0x381   : > { %v553_v4 = vsub.f32 %v545_v49, %v552_v63  ;;  %337 = vadd.xlane.f32.xlu0 %v336_v1 }
 0x382   : > { %749 = vmatmul.mubr.msk.bf16.vlgmr.msra.gmra.mrb[4].mxu0 %vm169_vm1, %v339_v3 }
 0x383   : > { %v554_v2 = vmul.f32 1.442695, %v553_v4  ;;  %759 = vmatpush3.bf16.msra.mxu0 %v456_v62  ;;  %760 = vmatprep.mubr.msk.bf16.mxu0 %vm826_vm0, %v825_v0 }
 0x384   : > { %770 = vmatprep.subr.bf16.mxu0 %v825_v0  ;;  %v561_v5 = vpop.permute.xlu0 %560 }
 0x385   : > { %807 = vpow2.f32 %v554_v2  ;;  %v566_v7 = vsel %vm231_vm2, %v561_v5, 0 }
 0x387   : > { %v806_v6 = vpop.eup %805 }
 0x388   : > { %v446_v8 = vsel %vm169_vm1, %v806_v6, 0.0  ;;  %v449_v9 = vpack.c.bf16 %v806_v6, %v806_v6 }
 0x389   : > { %447 = vadd.xlane.f32.xlu1 %v446_v8 }
 0x38a   : > { %761 = vmatmul.mubr.msk.bf16.vlgmr.msra.gmra.mrb[8].mxu0 %vm169_vm1, %v449_v9 }
 0x38b   : > { %771 = vmatpush3.bf16.msra.mxu0 %v566_v7  ;;  %772 = vmatprep.mubr.msk.bf16.mxu0 %vm826_vm0, %v825_v0 }
 0x38f   : > { %v808_v10 = vpop.eup %807 }
 0x390   : > { %v556_v11 = vsel %vm169_vm1, %v808_v10, 0.0  ;;  %v559_v12 = vpack.c.bf16 %v808_v10, %v808_v10 }
 0x391   : > { %557 = vadd.xlane.f32.xlu0 %v556_v11 }
 0x392   : > { %773 = vmatmul.mubr.msk.bf16.vlgmr.msra.gmra.mrb[12].mxu0 %vm169_vm1, %v559_v12 }
 0x395   : > { %223 = vadd.xlane.f32.xlu0 %v222_v13 }
 0x40e   : > { %v338_v14 = vpop.xlane.xlu0 %337 }
 0x40f   : > { %809 = vrcp.f32 %v338_v14 }
 0x416   : > { %v448_v15 = vpop.xlane.xlu1 %447 }
 0x417   : > { %811 = vrcp.f32 %v448_v15 }
 0x419   : > { %v810_v16 = vpop.eup %809 }
 0x41e   : > { %v558_v20 = vpop.xlane.xlu0 %557 }
 0x41f   : > { %813 = vrcp.f32 %v558_v20 }
 0x421   : > { %v812_v23 = vpop.eup %811 }
 0x422   : > { %v224_v35 = vpop.xlane.xlu0 %223 }
 0x423   : > { %815 = vrcp.f32 %v224_v35 }
 0x429   : > { %v814_v28 = vpop.eup %813 }
 0x42d   : > { %v816_v36 = vpop.eup %815 }
 0x42e   : > { %v276_v38 = vmul.f32 %v816_v36, %v922_v32 }
 0x455   : > { %v382_v17 = vpop.f32.mrb[4].mxu0 }
 0x456   : > { %v389_v18 = vmul.f32 %v810_v16, %v382_v17  ;;  %v750_v19 = vpop.f32.mrb[5].mxu0 }
 0x457   : > { %v385_v0 = vpop.f32.mrb[6].mxu0 }
 0x458   : > { %611 = vrot.lane.b32.xlu0 %v389_v18, %s838_s29  ;;  %v751_v22 = vpop.f32.mrb[7].mxu0 }
 0x45d   : > { %v492_v24 = vpop.f32.mrb[8].mxu0 }
 0x45e   : > { %v499_v25 = vmul.f32 %v812_v23, %v492_v24  ;;  %v762_v26 = vpop.f32.mrb[9].mxu0 }
 0x45f   : > { %v495_v21 = vpop.f32.mrb[10].mxu0 }
 0x460   : > { %615 = vrot.lane.b32.xlu1 %v499_v25, %s839_s30  ;;  %v763_v27 = vpop.f32.mrb[11].mxu0 }
 0x465   : > { %v602_v29 = vpop.f32.mrb[12].mxu0 }
 0x466   : > { %v609_v30 = vmul.f32 %v814_v28, %v602_v29  ;;  %v774_v31 = vpop.f32.mrb[13].mxu0 }
 0x467   : > { %v605_v33 = vpop.f32.mrb[14].mxu0 }
 0x468   : > { %619 = vrot.lane.b32.xlu0 %v609_v30, %s840_s3  ;;  %v775_v34 = vpop.f32.mrb[15].mxu0 }
 0x4ca   : > { %v612_v37 = vpop.permute.xlu0 %611 }
 0x4cb   : > { %v622_v40 = vsel %vm169_vm1, %v276_v38, %v612_v37 }
 0x4d2   : > { %v616_v39 = vpop.permute.xlu1 %615 }
 0x4d3   : > { %v624_v41 = vsel %vm623_vm3, %v622_v40, %v616_v39 }
 0x4da   : > { %v620_v42 = vpop.permute.xlu0 %619 }
 0x4db   : > { %v626_v43 = vsel %vm625_vm4, %v624_v41, %v620_v42 }
 0x4dc   : > { %v627_v44 = vpack.c.bf16 %v626_v43, %v626_v43 }
 0x4de   : > { %629 = vst.msk [vmem:[%s152_s6] sm:$0xf] %vm628_vm5, %v627_v44 }
 0x4df PF: > { %s12_s9 = sadd.s32 1, %s823_s9  }
 0x4e0   : > { %p9_p4 = scmp.ge.s32.totalorder %s12_s9, 4  }
 0x4e2   :  { %11 = sbr.rel (!%p9_p4) target bundleno = 1 (0x1), region = 61 }

// kernel: encoder_forward.13
= control target key start
LH: loop header
LB: loop body
LE: loop exit
PB: predicated region body
PF: predicated region fallthrough
CT: control target
= control target key end

     0   :  { %vm28_vm0 = vcmask 261120   ;;  %v224_v0 = vmov 0.0   ;;  %vm225_vm1 = vmmov 0   ;;  %vm182_vm2 = vcmask 257024   ;;  %s297_s1 = inlined_call_operand.vmem [shape: bf16[32,32], index: 1, kind: input, shape index: {}]   ;;  %s298_s0 = inlined_call_operand.vmem [shape: bf16[16,32], index: 0, kind: input, shape index: {}]   ;;  %s299_s3 = inlined_call_operand.vmem [shape: bf16[16,32], index: 3, kind: input, shape index: {}]   ;;  %s300_s2 = inlined_call_operand.vmem [shape: f32[1,32], index: 2, kind: input, shape index: {}]   ;;  %s301_s4 = inlined_call_operand.vmem [shape: f32[1,32], index: 4, kind: input, shape index: {}]   ;;  %s302_s5 = inlined_call_operand.vmem [shape: f32[1,32], index: 5, kind: input, shape index: {}]   ;;  %s303_s6 = inlined_call_operand.vmem [shape: bf16[16,32], index: 6, kind: output, shape index: {}]  }
   0x1   :  { %207 = vmatprep.subr.bf16.mxu0 %v224_v0  ;;  %v217_v1 = vld [vmem:[%s297_s1] sm:$0xff]   ;;  %211 = vmatprep.mubr.msk.bf16.mxu0 %vm225_vm1, %v224_v0  ;;  %29 = vst.msk [vmem:[#allocation2] sm:$0xff] %vm28_vm0, %v224_v0  ;;  %30 = vst.msk [vmem:[#allocation2 + $0x8] sm:$0xff] %vm28_vm0, %v224_v0  ;;  %v218_v2 = vld [vmem:[%s297_s1 + $0x8] sm:$0xff]  }
   0x2   :  { %208 = vmatpush3.bf16.msra.mxu0 %v217_v1  ;;  %v219_v3 = vld [vmem:[%s298_s0] sm:$0xff]  }
   0x3   :  { %209 = vmatprep.subr.bf16.mxu0 %v224_v0  ;;  %v201_v12 = vld [vmem:[%s299_s3] sm:$0xff]  }
   0x4   :  { %v193_v13 = vld [vmem:[%s300_s2] ss:$0 sm:$0xff]  ;;  %v202_v14 = vunpack.c.l.bf16 %v201_v12  ;;  %v203_v17 = vunpack.c.h.bf16 %v201_v12 }
   0x5   :  { %v194_v44 = vld [vmem:[%s301_s4] ss:$0 sm:$0xff] }
   0x6   :  { %210 = vmatpush3.bf16.msra.mxu0 %v218_v2  ;;  %v195_v46 = vld [vmem:[%s302_s5] ss:$0 sm:$0xff] }
   0x8   :  { %v31_v4 = vld [vmem:[#allocation2] sm:$0xff]  ;;  %v32_v6 = vld [vmem:[#allocation2 + $0x8] sm:$0xff] }
   0x9   :  { %212 = vmatmul.mubr.msk.bf16.vlgmr.msra.gmra.mrb[0].mxu0 %vm28_vm0, %v219_v3 }
  0xdc   :  { %v94_v5 = vpop.f32.mrb[0].mxu0 }
  0xdd   :  { %v101_v7 = vadd.f32 %v94_v5, %v31_v4  ;;  %v213_v8 = vpop.f32.mrb[1].mxu0 }
  0xde   :  { %v97_v9 = vpop.f32.mrb[2].mxu0 }
  0xdf   :  { %103 = vst.msk [vmem:[#allocation2] sm:$0xff] %vm28_vm0, %v101_v7  ;;  %v102_v10 = vadd.f32 %v97_v9, %v32_v6  ;;  %v214_v11 = vpop.f32.mrb[3].mxu0 }
  0xe1   :  { %104 = vst.msk [vmem:[#allocation2 + $0x8] sm:$0xff] %vm28_vm0, %v102_v10 }
  0xe6   :  { %v108_v15 = vld [vmem:[#allocation2] sm:$0xff] }
  0xe7   :  { %v117_v16 = vadd.f32 %v193_v13, %v108_v15 }
  0xe8   :  { %v109_v18 = vld [vmem:[#allocation2 + $0x8] sm:$0xff] }
  0xe9   :  { %v123_v19 = vadd.f32 %v202_v14, %v117_v16  ;;  %v118_v20 = vadd.f32 %v193_v13, %v109_v18 }
  0xeb   :  { %v127_v21 = vsel %vm28_vm0, %v123_v19, 0.0  ;;  %v136_v22 = vmul.f32 %v123_v19, %v123_v19  ;;  %v124_v23 = vadd.f32 %v203_v17, %v118_v20 }
  0xec   :  { %128 = vadd.xlane.f32.xlu0 %v127_v21 }
  0xed   :  { %v138_v24 = vsel %vm28_vm0, %v136_v22, 0.0  ;;  %v137_v25 = vmul.f32 %v124_v23, %v124_v23  ;;  %v130_v26 = vsel %vm28_vm0, %v124_v23, 0.0 }
  0xee   :  { %139 = vadd.xlane.f32.xlu1 %v138_v24 }
  0xef   :  { %v141_v27 = vsel %vm28_vm0, %v137_v25, 0.0 }
  0xf0   :  { %131 = vadd.xlane.f32.xlu0 %v130_v26 }
  0xf2   :  { %142 = vadd.xlane.f32.xlu1 %v141_v27 }
 0x179   :  { %v129_v28 = vpop.xlane.xlu0 %128 }
 0x17a   :  { %v134_v29 = vmul.f32 0.03125, %v129_v28 }
 0x17b   :  { %v140_v30 = vpop.xlane.xlu1 %139 }
 0x17c   :  { %v146_v31 = vmul.f32 %v134_v29, %v134_v29  ;;  %v144_v32 = vmul.f32 0.03125, %v140_v30  ;;  %v150_v42 = vsub.f32 %v123_v19, %v134_v29 }
 0x17d   :  { %v132_v33 = vpop.xlane.xlu0 %131 }
 0x17e   :  { %v148_v34 = vsub.f32 %v144_v32, %v146_v31  ;;  %v135_v35 = vmul.f32 0.03125, %v132_v33 }
 0x17f   :  { %v143_v36 = vpop.xlane.xlu1 %142 }
 0x180   :  { %v152_v37 = vadd.f32 1e-05, %v148_v34  ;;  %v147_v38 = vmul.f32 %v135_v35, %v135_v35  ;;  %v145_v39 = vmul.f32 0.03125, %v143_v36  ;;  %v151_v48 = vsub.f32 %v124_v23, %v135_v35 }
 0x182   :  { %220 = vrsqrt.f32 %v152_v37  ;;  %v149_v40 = vsub.f32 %v145_v39, %v147_v38 }
 0x184   :  { %v153_v41 = vadd.f32 1e-05, %v149_v40 }
 0x186   :  { %222 = vrsqrt.f32 %v153_v41 }
 0x18c   :  { %v221_v43 = vpop.eup %220 }
 0x18d   :  { %v156_v45 = vmul.f32 %v221_v43, %v150_v42 }
 0x18f   :  { %v164_v47 = vmul.f32 %v194_v44, %v156_v45 }
 0x190   :  { %v223_v49 = vpop.eup %222 }
 0x191   :  { %v172_v50 = vadd.f32 %v195_v46, %v164_v47  ;;  %v157_v51 = vmul.f32 %v223_v49, %v151_v48 }
 0x193   :  { %v198_v52 = vpack.c.bf16 %v172_v50, %v172_v50  ;;  %v165_v53 = vmul.f32 %v194_v44, %v157_v51 }
 0x195   :  { %183 = vst.msk [vmem:[%s303_s6] sm:$0xf] %vm182_vm2, %v198_v52  ;;  %v173_v54 = vadd.f32 %v195_v46, %v165_v53 }
 0x197   :  { %v199_v55 = vpack.c.bf16 %v173_v54, %v173_v54 }
 0x199   :  { %184 = vst.msk [vmem:[%s303_s6 + $0x4] sm:$0xf] %vm182_vm2, %v199_v55 }

// kernel: encoder_forward.21
= control target key start
LH: loop header
LB: loop body
LE: loop exit
PB: predicated region body
PF: predicated region fallthrough
CT: control target
= control target key end

     0   :  { %vm21_vm0 = vcmask 261120   ;;  %s174_s0 = inlined_call_operand.vmem [shape: bf16[16,32], index: 0, kind: input, shape index: {}]   ;;  %s175_s1 = inlined_call_operand.vmem [shape: f32[1,32], index: 1, kind: input, shape index: {}]   ;;  %s176_s2 = inlined_call_operand.vmem [shape: f32[1,32], index: 2, kind: input, shape index: {}]   ;;  %s177_s3 = inlined_call_operand.hbm [shape: f32[16,32], index: 3, kind: output, shape index: {}]  }
   0x1   :  { %v90_v0 = vld [vmem:[%s174_s0] sm:$0xff]  }
   0x2   :  { %8 = vsyncpa [#allocation3], 0  ;;  %v91_v1 = vunpack.c.l.bf16 %v90_v0  ;;  %v92_v2 = vunpack.c.h.bf16 %v90_v0  ;;  %v87_v25 = vld [vmem:[%s175_s1] ss:$0 sm:$0xff]  ;;  %s124_s17 = smov [#allocation2]  }
   0x3   :  { %v88_v27 = vld [vmem:[%s176_s2] ss:$0 sm:$0xff]  ;;  %s76_s18 = sshll.u32 %s124_s17, 4  ;;  %s77_s18 = int_to_ptr.vmem [resolvable:$true] %s76_s18 }
   0x4   :  { %v22_v3 = vsel %vm21_vm0, %v91_v1, 0.0  ;;  %v31_v4 = vmul.f32 %v91_v1, %v91_v1  ;;  %v32_v5 = vmul.f32 %v92_v2, %v92_v2  ;;  %v25_v7 = vsel %vm21_vm0, %v92_v2, 0.0  ;;  %s100_s1 = scalar_lea.vmem %s77_s18, 256  ;;  %p105_p1 = scmp.lt.s32.totalorder %s77_s18, %s77_s18 }
   0x5   :  { %23 = vadd.xlane.f32.xlu0 %v22_v3  ;;  %p101_p0 = scmp.ne.s32.totalorder %s77_s18, %s100_s1  ;;  %p106_p2 = scmp.lt.s32.totalorder %s100_s1, %s100_s1 }
   0x6   :  { %v33_v6 = vsel %vm21_vm0, %v31_v4, 0.0  ;;  %v36_v8 = vsel %vm21_vm0, %v32_v5, 0.0 }
   0x7   :  { %34 = vadd.xlane.f32.xlu1 %v33_v6  ;;  %p107_p3 = por %p106_p2, %p105_p1 }
   0x9   :  { %26 = vadd.xlane.f32.xlu0 %v25_v7  ;;  %p108_p4 = pnand %p107_p3, %p101_p0 }
   0xb   :  { %37 = vadd.xlane.f32.xlu1 %v36_v8 }
  0x92   :  { %v24_v9 = vpop.xlane.xlu0 %23 }
  0x93   :  { %v29_v10 = vmul.f32 0.03125, %v24_v9 }
  0x94   :  { %v35_v11 = vpop.xlane.xlu1 %34 }
  0x95   :  { %v41_v12 = vmul.f32 %v29_v10, %v29_v10  ;;  %v39_v13 = vmul.f32 0.03125, %v35_v11  ;;  %v45_v23 = vsub.f32 %v91_v1, %v29_v10 }
  0x96   :  { %v27_v14 = vpop.xlane.xlu0 %26 }
  0x97   :  { %v43_v15 = vsub.f32 %v39_v13, %v41_v12  ;;  %v30_v16 = vmul.f32 0.03125, %v27_v14 }
  0x98   :  { %v38_v17 = vpop.xlane.xlu1 %37 }
  0x99   :  { %v47_v18 = vadd.f32 1e-05, %v43_v15  ;;  %v42_v19 = vmul.f32 %v30_v16, %v30_v16  ;;  %v40_v20 = vmul.f32 0.03125, %v38_v17  ;;  %v46_v28 = vsub.f32 %v92_v2, %v30_v16 }
  0x9b   :  { %96 = vrsqrt.f32 %v47_v18  ;;  %v44_v21 = vsub.f32 %v40_v20, %v42_v19 }
  0x9d   :  { %v48_v22 = vadd.f32 1e-05, %v44_v21 }
  0x9f   :  { %98 = vrsqrt.f32 %v48_v22 }
  0xa5   :  { %v97_v24 = vpop.eup %96 }
  0xa6   :  { %v51_v26 = vmul.f32 %v97_v24, %v45_v23 }
  0xa8   :  { %v59_v29 = vmul.f32 %v87_v25, %v51_v26 }
  0xa9   :  { %v99_v30 = vpop.eup %98 }
  0xaa   :  { %v52_v31 = vmul.f32 %v99_v30, %v46_v28  ;;  %v67_v32 = vadd.f32 %v88_v27, %v59_v29 }
  0xac   :  { %v60_v33 = vmul.f32 %v87_v25, %v52_v31  ;;  %69 = vst.msk [vmem:[#allocation2] sm:$0xff] %vm21_vm0, %v67_v32 }
  0xae   :  { %v68_v34 = vadd.f32 %v88_v27, %v60_v33 }
  0xb0   :  { %70 = vst.msk [vmem:[#allocation2 + $0x8] sm:$0xff] %vm21_vm0, %v68_v34 }
  0xb1   :  { %111 = shalt.err (!%p108_p4)
}
  0xb2   :  { %s112_s20 = scalar_lea.hbm %s177_s3, 256 }
  0xb3   :  { %p113_p5 = scmp.ne.s32.totalorder %s177_s3, %s112_s20  ;;  %p116_p6 = scmp.lt.u32.totalorder %s112_s20, %s177_s3 }
  0xb5   :  { %p118_p7 = pnand %p116_p6, %p113_p5 }
  0xb7   :  { %121 = shalt.err (!%p118_p7)
}
  0xb8   :  { %s125_s25 = smov 128   ;;  %s126_s26 = smov 8  }
  0xb9   :  { %82 = dma.vmem_to_hbm [thread:$0]  %s77_s18, 256, %s177_s3, [#allocation3], %s125_s25, %s125_s25, %s126_s26  }
  0xba   :  { %122 = dma.done.wait [#allocation3], 256  }
  0xbb   :  { %123 = vsyncadd [#allocation3], 4294967040 }
  0xbc   :  { %86 = vsyncpa [#allocation3], 1 }

// kernel: encoder_forward.15
= control target key start
LH: loop header
LB: loop body
LE: loop exit
PB: predicated region body
PF: predicated region fallthrough
CT: control target
= control target key end

     0   :  { %vm28_vm0 = vcmask 261120   ;;  %v251_v0 = vmov 0.0   ;;  %vm252_vm1 = vmmov 0   ;;  %vm72_vm2 = vcmask 523264   ;;  %s329_s1 = inlined_call_operand.vmem [shape: bf16[64,32], index: 1, kind: input, shape index: {}]   ;;  %s330_s0 = inlined_call_operand.vmem [shape: bf16[16,64], index: 0, kind: input, shape index: {}]   ;;  %s331_s3 = inlined_call_operand.vmem [shape: bf16[16,32], index: 3, kind: input, shape index: {}]   ;;  %s332_s2 = inlined_call_operand.vmem [shape: f32[1,32], index: 2, kind: input, shape index: {}]   ;;  %s333_s4 = inlined_call_operand.vmem [shape: f32[1,32], index: 4, kind: input, shape index: {}]   ;;  %s334_s5 = inlined_call_operand.vmem [shape: f32[1,32], index: 5, kind: input, shape index: {}]   ;;  %s335_s6 = inlined_call_operand.vmem [shape: bf16[16,32], index: 6, kind: output, shape index: {}]  }
   0x1   :  { %228 = vmatprep.subr.bf16.mxu0 %v251_v0  ;;  %v242_v1 = vld [vmem:[%s329_s1] sm:$0xff]   ;;  %236 = vmatprep.mubr.msk.bf16.mxu0 %vm252_vm1, %v251_v0  ;;  %29 = vst.msk [vmem:[#allocation2] sm:$0xff] %vm28_vm0, %v251_v0  ;;  %30 = vst.msk [vmem:[#allocation2 + $0x8] sm:$0xff] %vm28_vm0, %v251_v0  ;;  %v243_v2 = vld [vmem:[%s329_s1 + $0x8] sm:$0xff]   ;;  %vm199_vm3 = vcmask 257024  }
   0x2   :  { %229 = vmatpush3.bf16.msra.mxu0 %v242_v1  ;;  %v244_v3 = vld [vmem:[%s329_s1 + $0x10] sm:$0xff]   ;;  %v245_v4 = vld [vmem:[%s329_s1 + $0x18] sm:$0xff]   ;;  %v246_v5 = vld [vmem:[%s330_s0] sm:$0xff]  }
   0x3   :  { %230 = vmatprep.subr.bf16.mxu0 %v251_v0  ;;  %v220_v14 = vld [vmem:[%s331_s3] sm:$0xff]  }
   0x4   :  { %v212_v15 = vld [vmem:[%s332_s2] ss:$0 sm:$0xff]  ;;  %v221_v16 = vunpack.c.l.bf16 %v220_v14  ;;  %v222_v19 = vunpack.c.h.bf16 %v220_v14 }
   0x5   :  { %v213_v46 = vld [vmem:[%s333_s4] ss:$0 sm:$0xff] }
   0x6   :  { %231 = vmatpush3.bf16.msra.mxu0 %v243_v2  ;;  %v214_v48 = vld [vmem:[%s334_s5] ss:$0 sm:$0xff] }
   0x7   :  { %232 = vmatprep.subr.bf16.mxu0 %v251_v0 }
   0x8   :  { %v31_v6 = vld [vmem:[#allocation2] sm:$0xff]  ;;  %v32_v8 = vld [vmem:[#allocation2 + $0x8] sm:$0xff] }
   0xa   :  { %233 = vmatpush3.bf16.msra.mxu0 %v244_v3 }
   0xb   :  { %234 = vmatprep.subr.bf16.mxu0 %v251_v0 }
   0xe   :  { %235 = vmatpush3.bf16.msra.mxu0 %v245_v4 }
  0x11   :  { %237 = vmatmul.mubr.msk.bf16.vlgmr.msra.gmra.mrb[0].mxu0 %vm72_vm2, %v246_v5 }
  0xe4   :  { %v110_v7 = vpop.f32.mrb[0].mxu0 }
  0xe5   :  { %v117_v9 = vadd.f32 %v110_v7, %v31_v6  ;;  %v238_v10 = vpop.f32.mrb[1].mxu0 }
  0xe6   :  { %v113_v11 = vpop.f32.mrb[2].mxu0 }
  0xe7   :  { %120 = vst.msk [vmem:[#allocation2] sm:$0xff] %vm28_vm0, %v117_v9  ;;  %v118_v12 = vadd.f32 %v113_v11, %v32_v8  ;;  %v239_v13 = vpop.f32.mrb[3].mxu0 }
  0xe9   :  { %121 = vst.msk [vmem:[#allocation2 + $0x8] sm:$0xff] %vm28_vm0, %v118_v12 }
  0xee   :  { %v125_v17 = vld [vmem:[#allocation2] sm:$0xff] }
  0xef   :  { %v134_v18 = vadd.f32 %v212_v15, %v125_v17 }
  0xf0   :  { %v126_v20 = vld [vmem:[#allocation2 + $0x8] sm:$0xff] }
  0xf1   :  { %v140_v21 = vadd.f32 %v221_v16, %v134_v18  ;;  %v135_v22 = vadd.f32 %v212_v15, %v126_v20 }
  0xf3   :  { %v144_v23 = vsel %vm28_vm0, %v140_v21, 0.0  ;;  %v153_v24 = vmul.f32 %v140_v21, %v140_v21  ;;  %v141_v25 = vadd.f32 %v222_v19, %v135_v22 }
  0xf4   :  { %145 = vadd.xlane.f32.xlu0 %v144_v23 }
  0xf5   :  { %v155_v26 = vsel %vm28_vm0, %v153_v24, 0.0  ;;  %v154_v27 = vmul.f32 %v141_v25, %v141_v25  ;;  %v147_v28 = vsel %vm28_vm0, %v141_v25, 0.0 }
  0xf6   :  { %156 = vadd.xlane.f32.xlu1 %v155_v26 }
  0xf7   :  { %v158_v29 = vsel %vm28_vm0, %v154_v27, 0.0 }
  0xf8   :  { %148 = vadd.xlane.f32.xlu0 %v147_v28 }
  0xfa   :  { %159 = vadd.xlane.f32.xlu1 %v158_v29 }
 0x181   :  { %v146_v30 = vpop.xlane.xlu0 %145 }
 0x182   :  { %v151_v31 = vmul.f32 0.03125, %v146_v30 }
 0x183   :  { %v157_v32 = vpop.xlane.xlu1 %156 }
 0x184   :  { %v163_v33 = vmul.f32 %v151_v31, %v151_v31  ;;  %v161_v34 = vmul.f32 0.03125, %v157_v32  ;;  %v167_v44 = vsub.f32 %v140_v21, %v151_v31 }
 0x185   :  { %v149_v35 = vpop.xlane.xlu0 %148 }
 0x186   :  { %v165_v36 = vsub.f32 %v161_v34, %v163_v33  ;;  %v152_v37 = vmul.f32 0.03125, %v149_v35 }
 0x187   :  { %v160_v38 = vpop.xlane.xlu1 %159 }
 0x188   :  { %v169_v39 = vadd.f32 1e-05, %v165_v36  ;;  %v164_v40 = vmul.f32 %v152_v37, %v152_v37  ;;  %v162_v41 = vmul.f32 0.03125, %v160_v38  ;;  %v168_v50 = vsub.f32 %v141_v25, %v152_v37 }
 0x18a   :  { %247 = vrsqrt.f32 %v169_v39  ;;  %v166_v42 = vsub.f32 %v162_v41, %v164_v40 }
 0x18c   :  { %v170_v43 = vadd.f32 1e-05, %v166_v42 }
 0x18e   :  { %249 = vrsqrt.f32 %v170_v43 }
 0x194   :  { %v248_v45 = vpop.eup %247 }
 0x195   :  { %v173_v47 = vmul.f32 %v248_v45, %v167_v44 }
 0x197   :  { %v181_v49 = vmul.f32 %v213_v46, %v173_v47 }
 0x198   :  { %v250_v51 = vpop.eup %249 }
 0x199   :  { %v189_v52 = vadd.f32 %v214_v48, %v181_v49  ;;  %v174_v53 = vmul.f32 %v250_v51, %v168_v50 }
 0x19b   :  { %v217_v54 = vpack.c.bf16 %v189_v52, %v189_v52  ;;  %v182_v55 = vmul.f32 %v213_v46, %v174_v53 }
 0x19d   :  { %200 = vst.msk [vmem:[%s335_s6] sm:$0xf] %vm199_vm3, %v217_v54  ;;  %v190_v56 = vadd.f32 %v214_v48, %v182_v55 }
 0x19f   :  { %v218_v57 = vpack.c.bf16 %v190_v56, %v190_v56 }
 0x1a1   :  { %201 = vst.msk [vmem:[%s335_s6 + $0x4] sm:$0xf] %vm199_vm3, %v218_v57 }

</bundles_post_ra>
